<compile_context>
chip_gen: v7x
topology: tpu7x:2x2x1
jax: 0.10.0
libtpu: 0.0.40
codegen_flags: <defaults>
</compile_context>

<pallas_src>
import jax
import jax.numpy as jnp
import numpy as np
from jax.experimental import pallas as pl
from jax.experimental.pallas import tpu as pltpu

# Model dims (from the PyTorch module usage: in_dim=4, hidden=32, out_dim=4, 2 layers).
SEQ = 8
BATCH = 2
IN_DIM = 4
HIDDEN = 32
OUT_DIM = 4
LAYERS = 2

# Padded dims so every per-step tile is a full (8,128) vreg.
BATCH_PAD = 8
IN_PAD = 8
GATES = 4 * HIDDEN          # 128 lanes
OUT_PAD = GATES             # kernel output is lane-padded to 128

# Weight-slab row offsets (each section starts on a multiple of 8 rows).
R_WIH0 = 0                  # (IN_PAD, 128)   rows 0..7   (rows 4..7 zero)
R_WHH0 = 8                  # (32, 128)       rows 8..39
R_WIH1 = 40                 # (32, 128)       rows 40..71
R_WHH1 = 72                 # (32, 128)       rows 72..103
R_B = 104                   # row 104 = b_ih0+b_hh0, row 105 = b_ih1+b_hh1, rest zero
R_WFC = 112                 # (32, 128)       rows 112..143 (lanes 4..127 zero)
R_BFC = 144                 # row 144 = b_fc  (lanes 4..127 = -1e30), rest unused
SLAB_ROWS = 152
NEG_FILL = -1e30            # exp(NEG_FILL) == 0 in f32


def lstm_igt_kernel(x_ref,    # (SEQ*BATCH_PAD, IN_PAD) f32
                    w_ref,    # (SLAB_ROWS, 128) f32 weight slab
                    o_ref,    # (SEQ*BATCH_PAD, OUT_PAD) f32
                    hs_scr):  # VMEM (SEQ*BATCH_PAD, HIDDEN) f32 scratch
    H = HIDDEN
    B = BATCH_PAD

    # ---- Static slab views (single DMA already done by the prologue). ----
    w_ih0 = w_ref[R_WIH0:R_WIH0 + IN_PAD, :]                          # (8, 128)
    w_hh0 = w_ref[R_WHH0:R_WHH0 + H, :].astype(jnp.bfloat16)          # (32, 128) bf16
    w_ih1 = w_ref[R_WIH1:R_WIH1 + H, :]                               # (32, 128)
    w_hh1 = w_ref[R_WHH1:R_WHH1 + H, :].astype(jnp.bfloat16)          # (32, 128) bf16
    b0 = w_ref[R_B:R_B + 1, :]                                        # (1, 128)
    b1 = w_ref[R_B + 1:R_B + 2, :]                                    # (1, 128)
    w_fc = w_ref[R_WFC:R_WFC + H, :]                                  # (32, 128)
    b_fc = w_ref[R_BFC:R_BFC + 1, :]                                  # (1, 128)

    # ---- Per-lane gate constants, hoisted (JAX does not CSE broadcasts). ----
    # sigmoid(x) = 0.5*tanh(0.5*x) + 0.5  ->  ONE tanh push covers i/f/o (sigmoid)
    # and g (tanh) lanes of the (B, 4H) gate tile.
    lane = jax.lax.broadcasted_iota(jnp.int32, (B, 4 * H), 1)
    g_mask = (lane >= 2 * H) & (lane < 3 * H)
    scale = jnp.where(g_mask, 1.0, 0.5).astype(jnp.float32)
    shift = jnp.where(g_mask, 0.0, 0.5).astype(jnp.float32)

    def cell(gates, c_prev):
        t = jnp.tanh(gates * scale)            # single EUP push for all 4 gates
        act = t * scale + shift                # VPU: sigmoid on i/f/o lanes, tanh on g
        i = act[:, 0 * H:1 * H]
        f = act[:, 1 * H:2 * H]
        g = act[:, 2 * H:3 * H]
        o = act[:, 3 * H:4 * H]
        c_new = f * c_prev + i * g
        h_new = o * jnp.tanh(c_new)            # second (unavoidable) EUP push
        return h_new, c_new

    # ---- Layer-0 input projection for ALL timesteps: one matmul, off the chain. ----
    xg0_all = jnp.dot(x_ref[...], w_ih0,
                      preferred_element_type=jnp.float32) + b0        # (SEQ*B, 128)

    # ---- Pass 1: layer-0 recurrence (fully unrolled), stash h0(t) in scratch. ----
    h0 = jnp.zeros((B, H), jnp.float32)
    c0 = jnp.zeros((B, H), jnp.float32)
    for t in range(SEQ):
        gates0 = xg0_all[t * B:(t + 1) * B, :] + jnp.dot(
            h0.astype(jnp.bfloat16), w_hh0, preferred_element_type=jnp.float32)
        h0, c0 = cell(gates0, c0)
        hs_scr[t * B:(t + 1) * B, :] = h0      # 8-sublane aligned static-offset store

    # ---- Layer-1 input projection for ALL timesteps: one matmul (no per-step concat). ----
    xg1_all = jnp.dot(hs_scr[...], w_ih1,
                      preferred_element_type=jnp.float32) + b1        # (SEQ*B, 128)

    # ---- Pass 2: layer-1 recurrence; reuse the scratch for h1(t). ----
    h1 = jnp.zeros((B, H), jnp.float32)
    c1 = jnp.zeros((B, H), jnp.float32)
    for t in range(SEQ):
        gates1 = xg1_all[t * B:(t + 1) * B, :] + jnp.dot(
            h1.astype(jnp.bfloat16), w_hh1, preferred_element_type=jnp.float32)
        h1, c1 = cell(gates1, c1)
        hs_scr[t * B:(t + 1) * B, :] = h1

    # ---- Epilogue (runs once): ReLU -> FC -> softmax over all SEQ*B rows. ----
    hs = jnp.maximum(hs_scr[...], 0.0)
    logits = jnp.dot(hs, w_fc, preferred_element_type=jnp.float32) + b_fc
    # Padded lanes of b_fc are -1e30 -> exp() == 0 there, so the full 128-lane sum is
    # the true OUT_DIM denominator.  Max-subtraction dropped: ReLU(h1) in [0,1) and
    # |w_fc| <= 1/sqrt(H) bound |logits| <~ 6, which is safe for f32 exp.
    e = jnp.exp(logits)
    denom = jnp.sum(e, axis=-1, keepdims=True)
    # approx=True -> EUP vrcp (otherwise-idle slot); ~2^-12 relative error.
    o_ref[...] = (e * pl.reciprocal(denom, approx=True)).astype(o_ref.dtype)


@jax.jit
def lstm_igt_forward(x, w_slab):
    """x: (SEQ, BATCH, IN_DIM) f32; w_slab: (SLAB_ROWS, 128) f32."""
    # Pad batch 2->8 and features 4->8 so per-step tiles are full (8,128) vregs, then
    # flatten (seq, batch) -> rows (row-major, so the reshape is free).
    xp = jnp.zeros((SEQ, BATCH_PAD, IN_PAD), jnp.float32)
    xp = xp.at[:, :BATCH, :IN_DIM].set(x.astype(jnp.float32))
    x2 = xp.reshape(SEQ * BATCH_PAD, IN_PAD)

    out = pl.pallas_call(
        lstm_igt_kernel,
        out_shape=jax.ShapeDtypeStruct((SEQ * BATCH_PAD, OUT_PAD), jnp.float32),
        in_specs=[pl.BlockSpec(memory_space=pltpu.MemorySpace.VMEM),
                  pl.BlockSpec(memory_space=pltpu.MemorySpace.VMEM)],
        out_specs=pl.BlockSpec(memory_space=pltpu.MemorySpace.VMEM),
        scratch_shapes=[pltpu.VMEM((SEQ * BATCH_PAD, HIDDEN), jnp.float32)],
    )(x2, w_slab)

    # Strip batch / lane padding: (SEQ, BATCH, OUT_DIM), matching the module output.
    return out.reshape(SEQ, BATCH_PAD, OUT_PAD)[:, :BATCH, :OUT_DIM]


def init_params(key):
    """Deterministic init mimicking PyTorch nn.LSTM/nn.Linear U(-1/sqrt(H), 1/sqrt(H))."""
    bound = float(np.sqrt(1.0 / HIDDEN))
    keys = jax.random.split(key, 10)

    def u(k, shape):
        return jax.random.uniform(k, shape, jnp.float32, -bound, bound)

    return dict(
        w_ih0=u(keys[0], (4 * HIDDEN, IN_DIM)),
        w_hh0=u(keys[1], (4 * HIDDEN, HIDDEN)),
        b_ih0=u(keys[2], (4 * HIDDEN,)),
        b_hh0=u(keys[3], (4 * HIDDEN,)),
        w_ih1=u(keys[4], (4 * HIDDEN, HIDDEN)),
        w_hh1=u(keys[5], (4 * HIDDEN, HIDDEN)),
        b_ih1=u(keys[6], (4 * HIDDEN,)),
        b_hh1=u(keys[7], (4 * HIDDEN,)),
        w_fc=u(keys[8], (OUT_DIM, HIDDEN)),
        b_fc=u(keys[9], (OUT_DIM,)),
    )


def pack_weight_slab(p):
    """Pack all weights/biases into one (SLAB_ROWS, 128) f32 slab (single kernel DMA)."""
    slab = np.zeros((SLAB_ROWS, GATES), np.float32)
    slab[R_WIH0:R_WIH0 + IN_DIM, :] = np.asarray(p["w_ih0"]).T          # (4, 128)
    slab[R_WHH0:R_WHH0 + HIDDEN, :] = np.asarray(p["w_hh0"]).T          # (32, 128)
    slab[R_WIH1:R_WIH1 + HIDDEN, :] = np.asarray(p["w_ih1"]).T          # (32, 128)
    slab[R_WHH1:R_WHH1 + HIDDEN, :] = np.asarray(p["w_hh1"]).T          # (32, 128)
    slab[R_B, :] = np.asarray(p["b_ih0"] + p["b_hh0"])                  # (128,)
    slab[R_B + 1, :] = np.asarray(p["b_ih1"] + p["b_hh1"])              # (128,)
    slab[R_WFC:R_WFC + HIDDEN, :OUT_DIM] = np.asarray(p["w_fc"]).T      # (32, 4)
    slab[R_BFC, :] = NEG_FILL                                           # padded-lane kill
    slab[R_BFC, :OUT_DIM] = np.asarray(p["b_fc"])
    return jnp.asarray(slab)


def reference_forward(x, p):
    """Pure-JAX f32 reference of the PyTorch module's math (for correctness check)."""
    H = HIDDEN

    def run_layer(inp, w_ih, w_hh, b_ih, b_hh):
        w_ih_t = w_ih.T
        w_hh_t = w_hh.T
        b = (b_ih + b_hh)[None, :]

        def step(carry, x_t):
            h, c = carry
            gates = x_t @ w_ih_t + h @ w_hh_t + b
            i = jax.nn.sigmoid(gates[:, 0 * H:1 * H])
            f = jax.nn.sigmoid(gates[:, 1 * H:2 * H])
            g = jnp.tanh(gates[:, 2 * H:3 * H])
            o = jax.nn.sigmoid(gates[:, 3 * H:4 * H])
            c = f * c + i * g
            h = o * jnp.tanh(c)
            return (h, c), h

        init = (jnp.zeros((inp.shape[1], H), jnp.float32),
                jnp.zeros((inp.shape[1], H), jnp.float32))
        _, hs = jax.lax.scan(step, init, inp)
        return hs

    out = run_layer(x, p["w_ih0"], p["w_hh0"], p["b_ih0"], p["b_hh0"])
    out = run_layer(out, p["w_ih1"], p["w_hh1"], p["b_ih1"], p["b_hh1"])
    out = jnp.maximum(out, 0.0)
    logits = out @ p["w_fc"].T + p["b_fc"][None, :]
    return jax.nn.softmax(logits, axis=-1)


if __name__ == "__main__":
    key = jax.random.PRNGKey(0)
    k_x, k_p = jax.random.split(key)
    x = jax.random.normal(k_x, (SEQ, BATCH, IN_DIM), dtype=jnp.float32)
    params = init_params(k_p)
    w_slab = pack_weight_slab(params)

    out = lstm_igt_forward(x, w_slab)
    out = jax.block_until_ready(out)

    ref = reference_forward(x, params)
    # Permanent (documented) tolerance: the 16 recurrent matmuls use bf16 operands
    # (single MXU pass) and the softmax denominator uses the approx EUP reciprocal
    # (~2^-12 rel. error); combined output-probability error stays well under 5e-3.
    np.testing.assert_allclose(np.asarray(out), np.asarray(ref), atol=5e-3, rtol=1e-2)

    print("KERNEL_OK")
</pallas_src>

<mosaic_0001>
module attributes {stable_mosaic.version = 11 : i64} {
  func.func @lstm_igt_kernel(%arg0: memref<64x8xf32, #tpu.memory_space<vmem>>, %arg1: memref<152x128xf32, #tpu.memory_space<vmem>>, %arg2: memref<64x128xf32, #tpu.memory_space<vmem>>, %arg3: memref<64x32xf32, #tpu.memory_space<vmem>>) attributes {dimension_semantics = [], scalar_prefetch = 0 : i64, scratch_operands = 1 : i64, tpu.core_type = #tpu.core_type<tc>} {
    %c0 = arith.constant 0 : index
    %c0_0 = arith.constant 0 : index
    %0 = vector.load %arg1[%c0, %c0_0] : memref<152x128xf32, #tpu.memory_space<vmem>>, vector<8x128xf32>
    %c8 = arith.constant 8 : index
    %c0_1 = arith.constant 0 : index
    %1 = vector.load %arg1[%c8, %c0_1] : memref<152x128xf32, #tpu.memory_space<vmem>>, vector<32x128xf32>
    %2 = arith.truncf %1 : vector<32x128xf32> to vector<32x128xbf16>
    %c40 = arith.constant 40 : index
    %c0_2 = arith.constant 0 : index
    %3 = vector.load %arg1[%c40, %c0_2] : memref<152x128xf32, #tpu.memory_space<vmem>>, vector<32x128xf32>
    %c72 = arith.constant 72 : index
    %c0_3 = arith.constant 0 : index
    %4 = vector.load %arg1[%c72, %c0_3] : memref<152x128xf32, #tpu.memory_space<vmem>>, vector<32x128xf32>
    %5 = arith.truncf %4 : vector<32x128xf32> to vector<32x128xbf16>
    %c104 = arith.constant 104 : index
    %c0_4 = arith.constant 0 : index
    %6 = vector.load %arg1[%c104, %c0_4] : memref<152x128xf32, #tpu.memory_space<vmem>>, vector<1x128xf32>
    %c105 = arith.constant 105 : index
    %c0_5 = arith.constant 0 : index
    %7 = vector.load %arg1[%c105, %c0_5] : memref<152x128xf32, #tpu.memory_space<vmem>>, vector<1x128xf32>
    %c112 = arith.constant 112 : index
    %c0_6 = arith.constant 0 : index
    %8 = vector.load %arg1[%c112, %c0_6] : memref<152x128xf32, #tpu.memory_space<vmem>>, vector<32x128xf32>
    %c144 = arith.constant 144 : index
    %c0_7 = arith.constant 0 : index
    %9 = vector.load %arg1[%c144, %c0_7] : memref<152x128xf32, #tpu.memory_space<vmem>>, vector<1x128xf32>
    %10 = tpu.iota {dimensions = array<i32: 1>} : vector<8x128xi32>
    %c64_i32 = arith.constant 64 : i32
    %11 = vector.broadcast %c64_i32 : i32 to vector<8x128xi32>
    %12 = arith.cmpi sge, %10, %11 : vector<8x128xi32>
    %c96_i32 = arith.constant 96 : i32
    %13 = vector.broadcast %c96_i32 : i32 to vector<8x128xi32>
    %14 = arith.cmpi slt, %10, %13 : vector<8x128xi32>
    %15 = arith.andi %12, %14 : vector<8x128xi1>
    %cst = arith.constant 1.000000e+00 : f32
    %cst_8 = arith.constant 5.000000e-01 : f32
    %16 = vector.broadcast %cst : f32 to vector<8x128xf32>
    %17 = vector.broadcast %cst_8 : f32 to vector<8x128xf32>
    %18 = arith.select %15, %16, %17 : vector<8x128xi1>, vector<8x128xf32>
    %cst_9 = arith.constant 0.000000e+00 : f32
    %cst_10 = arith.constant 5.000000e-01 : f32
    %19 = vector.broadcast %cst_9 : f32 to vector<8x128xf32>
    %20 = vector.broadcast %cst_10 : f32 to vector<8x128xf32>
    %21 = arith.select %15, %19, %20 : vector<8x128xi1>, vector<8x128xf32>
    %c0_11 = arith.constant 0 : index
    %c0_12 = arith.constant 0 : index
    %22 = vector.load %arg0[%c0_11, %c0_12] : memref<64x8xf32, #tpu.memory_space<vmem>>, vector<64x8xf32>
    %cst_13 = arith.constant dense<0.000000e+00> : vector<64x128xf32>
    %23 = tpu.matmul %22, %0, %cst_13 {dimension_numbers = #tpu.dot_dimension_numbers<[1], [0], [0], [1], [0, 0, 1, 1], [], []>} : vector<64x8xf32>, vector<8x128xf32>, vector<64x128xf32> -> vector<64x128xf32>
    %24 = vector.broadcast %6 : vector<1x128xf32> to vector<64x128xf32>
    %25 = arith.addf %23, %24 : vector<64x128xf32>
    %cst_14 = arith.constant 0.000000e+00 : f32
    %26 = vector.broadcast %cst_14 : f32 to vector<8x32xf32>
    %cst_15 = arith.constant 0.000000e+00 : f32
    %27 = vector.broadcast %cst_15 : f32 to vector<8x32xf32>
    %28 = vector.extract_strided_slice %25 {offsets = [0, 0], sizes = [8, 128], strides = [1, 1]} : vector<64x128xf32> to vector<8x128xf32>
    %29 = arith.truncf %26 : vector<8x32xf32> to vector<8x32xbf16>
    %cst_16 = arith.constant dense<0.000000e+00> : vector<8x128xf32>
    %30 = tpu.matmul %29, %2, %cst_16 {dimension_numbers = #tpu.dot_dimension_numbers<[1], [0], [0], [1], [0, 0, 1, 1], [], []>} : vector<8x32xbf16>, vector<32x128xbf16>, vector<8x128xf32> -> vector<8x128xf32>
    %31 = arith.addf %28, %30 : vector<8x128xf32>
    %32 = arith.mulf %31, %18 : vector<8x128xf32>
    %33 = math.tanh %32 : vector<8x128xf32>
    %34 = arith.mulf %33, %18 : vector<8x128xf32>
    %35 = arith.addf %34, %21 : vector<8x128xf32>
    %36 = vector.extract_strided_slice %35 {offsets = [0, 0], sizes = [8, 32], strides = [1, 1]} : vector<8x128xf32> to vector<8x32xf32>
    %37 = vector.extract_strided_slice %35 {offsets = [0, 32], sizes = [8, 32], strides = [1, 1]} : vector<8x128xf32> to vector<8x32xf32>
    %38 = vector.extract_strided_slice %35 {offsets = [0, 64], sizes = [8, 32], strides = [1, 1]} : vector<8x128xf32> to vector<8x32xf32>
    %39 = vector.extract_strided_slice %35 {offsets = [0, 96], sizes = [8, 32], strides = [1, 1]} : vector<8x128xf32> to vector<8x32xf32>
    %40 = arith.mulf %37, %27 : vector<8x32xf32>
    %41 = arith.mulf %36, %38 : vector<8x32xf32>
    %42 = arith.addf %40, %41 : vector<8x32xf32>
    %43 = math.tanh %42 : vector<8x32xf32>
    %44 = arith.mulf %39, %43 : vector<8x32xf32>
    %c0_17 = arith.constant 0 : index
    %c0_18 = arith.constant 0 : index
    %45 = vector.load %arg3[%c0_17, %c0_18] : memref<64x32xf32, #tpu.memory_space<vmem>>, vector<8x32xf32>
    tpu.vector_store %arg3[%c0_17, %c0_18], %44 {strides = array<i32>} : memref<64x32xf32, #tpu.memory_space<vmem>>, vector<8x32xf32>,
    %46 = vector.extract_strided_slice %25 {offsets = [8, 0], sizes = [8, 128], strides = [1, 1]} : vector<64x128xf32> to vector<8x128xf32>
    %47 = arith.truncf %44 : vector<8x32xf32> to vector<8x32xbf16>
    %cst_19 = arith.constant dense<0.000000e+00> : vector<8x128xf32>
    %48 = tpu.matmul %47, %2, %cst_19 {dimension_numbers = #tpu.dot_dimension_numbers<[1], [0], [0], [1], [0, 0, 1, 1], [], []>} : vector<8x32xbf16>, vector<32x128xbf16>, vector<8x128xf32> -> vector<8x128xf32>
    %49 = arith.addf %46, %48 : vector<8x128xf32>
    %50 = arith.mulf %49, %18 : vector<8x128xf32>
    %51 = math.tanh %50 : vector<8x128xf32>
    %52 = arith.mulf %51, %18 : vector<8x128xf32>
    %53 = arith.addf %52, %21 : vector<8x128xf32>
    %54 = vector.extract_strided_slice %53 {offsets = [0, 0], sizes = [8, 32], strides = [1, 1]} : vector<8x128xf32> to vector<8x32xf32>
    %55 = vector.extract_strided_slice %53 {offsets = [0, 32], sizes = [8, 32], strides = [1, 1]} : vector<8x128xf32> to vector<8x32xf32>
    %56 = vector.extract_strided_slice %53 {offsets = [0, 64], sizes = [8, 32], strides = [1, 1]} : vector<8x128xf32> to vector<8x32xf32>
    %57 = vector.extract_strided_slice %53 {offsets = [0, 96], sizes = [8, 32], strides = [1, 1]} : vector<8x128xf32> to vector<8x32xf32>
    %58 = arith.mulf %55, %42 : vector<8x32xf32>
    %59 = arith.mulf %54, %56 : vector<8x32xf32>
    %60 = arith.addf %58, %59 : vector<8x32xf32>
    %61 = math.tanh %60 : vector<8x32xf32>
    %62 = arith.mulf %57, %61 : vector<8x32xf32>
    %c8_20 = arith.constant 8 : index
    %c0_21 = arith.constant 0 : index
    %63 = vector.load %arg3[%c8_20, %c0_21] : memref<64x32xf32, #tpu.memory_space<vmem>>, vector<8x32xf32>
    tpu.vector_store %arg3[%c8_20, %c0_21], %62 {strides = array<i32>} : memref<64x32xf32, #tpu.memory_space<vmem>>, vector<8x32xf32>,
    %64 = vector.extract_strided_slice %25 {offsets = [16, 0], sizes = [8, 128], strides = [1, 1]} : vector<64x128xf32> to vector<8x128xf32>
    %65 = arith.truncf %62 : vector<8x32xf32> to vector<8x32xbf16>
    %cst_22 = arith.constant dense<0.000000e+00> : vector<8x128xf32>
    %66 = tpu.matmul %65, %2, %cst_22 {dimension_numbers = #tpu.dot_dimension_numbers<[1], [0], [0], [1], [0, 0, 1, 1], [], []>} : vector<8x32xbf16>, vector<32x128xbf16>, vector<8x128xf32> -> vector<8x128xf32>
    %67 = arith.addf %64, %66 : vector<8x128xf32>
    %68 = arith.mulf %67, %18 : vector<8x128xf32>
    %69 = math.tanh %68 : vector<8x128xf32>
    %70 = arith.mulf %69, %18 : vector<8x128xf32>
    %71 = arith.addf %70, %21 : vector<8x128xf32>
    %72 = vector.extract_strided_slice %71 {offsets = [0, 0], sizes = [8, 32], strides = [1, 1]} : vector<8x128xf32> to vector<8x32xf32>
    %73 = vector.extract_strided_slice %71 {offsets = [0, 32], sizes = [8, 32], strides = [1, 1]} : vector<8x128xf32> to vector<8x32xf32>
    %74 = vector.extract_strided_slice %71 {offsets = [0, 64], sizes = [8, 32], strides = [1, 1]} : vector<8x128xf32> to vector<8x32xf32>
    %75 = vector.extract_strided_slice %71 {offsets = [0, 96], sizes = [8, 32], strides = [1, 1]} : vector<8x128xf32> to vector<8x32xf32>
    %76 = arith.mulf %73, %60 : vector<8x32xf32>
    %77 = arith.mulf %72, %74 : vector<8x32xf32>
    %78 = arith.addf %76, %77 : vector<8x32xf32>
    %79 = math.tanh %78 : vector<8x32xf32>
    %80 = arith.mulf %75, %79 : vector<8x32xf32>
    %c16 = arith.constant 16 : index
    %c0_23 = arith.constant 0 : index
    %81 = vector.load %arg3[%c16, %c0_23] : memref<64x32xf32, #tpu.memory_space<vmem>>, vector<8x32xf32>
    tpu.vector_store %arg3[%c16, %c0_23], %80 {strides = array<i32>} : memref<64x32xf32, #tpu.memory_space<vmem>>, vector<8x32xf32>,
    %82 = vector.extract_strided_slice %25 {offsets = [24, 0], sizes = [8, 128], strides = [1, 1]} : vector<64x128xf32> to vector<8x128xf32>
    %83 = arith.truncf %80 : vector<8x32xf32> to vector<8x32xbf16>
    %cst_24 = arith.constant dense<0.000000e+00> : vector<8x128xf32>
    %84 = tpu.matmul %83, %2, %cst_24 {dimension_numbers = #tpu.dot_dimension_numbers<[1], [0], [0], [1], [0, 0, 1, 1], [], []>} : vector<8x32xbf16>, vector<32x128xbf16>, vector<8x128xf32> -> vector<8x128xf32>
    %85 = arith.addf %82, %84 : vector<8x128xf32>
    %86 = arith.mulf %85, %18 : vector<8x128xf32>
    %87 = math.tanh %86 : vector<8x128xf32>
    %88 = arith.mulf %87, %18 : vector<8x128xf32>
    %89 = arith.addf %88, %21 : vector<8x128xf32>
    %90 = vector.extract_strided_slice %89 {offsets = [0, 0], sizes = [8, 32], strides = [1, 1]} : vector<8x128xf32> to vector<8x32xf32>
    %91 = vector.extract_strided_slice %89 {offsets = [0, 32], sizes = [8, 32], strides = [1, 1]} : vector<8x128xf32> to vector<8x32xf32>
    %92 = vector.extract_strided_slice %89 {offsets = [0, 64], sizes = [8, 32], strides = [1, 1]} : vector<8x128xf32> to vector<8x32xf32>
    %93 = vector.extract_strided_slice %89 {offsets = [0, 96], sizes = [8, 32], strides = [1, 1]} : vector<8x128xf32> to vector<8x32xf32>
    %94 = arith.mulf %91, %78 : vector<8x32xf32>
    %95 = arith.mulf %90, %92 : vector<8x32xf32>
    %96 = arith.addf %94, %95 : vector<8x32xf32>
    %97 = math.tanh %96 : vector<8x32xf32>
    %98 = arith.mulf %93, %97 : vector<8x32xf32>
    %c24 = arith.constant 24 : index
    %c0_25 = arith.constant 0 : index
    %99 = vector.load %arg3[%c24, %c0_25] : memref<64x32xf32, #tpu.memory_space<vmem>>, vector<8x32xf32>
    tpu.vector_store %arg3[%c24, %c0_25], %98 {strides = array<i32>} : memref<64x32xf32, #tpu.memory_space<vmem>>, vector<8x32xf32>,
    %100 = vector.extract_strided_slice %25 {offsets = [32, 0], sizes = [8, 128], strides = [1, 1]} : vector<64x128xf32> to vector<8x128xf32>
    %101 = arith.truncf %98 : vector<8x32xf32> to vector<8x32xbf16>
    %cst_26 = arith.constant dense<0.000000e+00> : vector<8x128xf32>
    %102 = tpu.matmul %101, %2, %cst_26 {dimension_numbers = #tpu.dot_dimension_numbers<[1], [0], [0], [1], [0, 0, 1, 1], [], []>} : vector<8x32xbf16>, vector<32x128xbf16>, vector<8x128xf32> -> vector<8x128xf32>
    %103 = arith.addf %100, %102 : vector<8x128xf32>
    %104 = arith.mulf %103, %18 : vector<8x128xf32>
    %105 = math.tanh %104 : vector<8x128xf32>
    %106 = arith.mulf %105, %18 : vector<8x128xf32>
    %107 = arith.addf %106, %21 : vector<8x128xf32>
    %108 = vector.extract_strided_slice %107 {offsets = [0, 0], sizes = [8, 32], strides = [1, 1]} : vector<8x128xf32> to vector<8x32xf32>
    %109 = vector.extract_strided_slice %107 {offsets = [0, 32], sizes = [8, 32], strides = [1, 1]} : vector<8x128xf32> to vector<8x32xf32>
    %110 = vector.extract_strided_slice %107 {offsets = [0, 64], sizes = [8, 32], strides = [1, 1]} : vector<8x128xf32> to vector<8x32xf32>
    %111 = vector.extract_strided_slice %107 {offsets = [0, 96], sizes = [8, 32], strides = [1, 1]} : vector<8x128xf32> to vector<8x32xf32>
    %112 = arith.mulf %109, %96 : vector<8x32xf32>
    %113 = arith.mulf %108, %110 : vector<8x32xf32>
    %114 = arith.addf %112, %113 : vector<8x32xf32>
    %115 = math.tanh %114 : vector<8x32xf32>
    %116 = arith.mulf %111, %115 : vector<8x32xf32>
    %c32 = arith.constant 32 : index
    %c0_27 = arith.constant 0 : index
    %117 = vector.load %arg3[%c32, %c0_27] : memref<64x32xf32, #tpu.memory_space<vmem>>, vector<8x32xf32>
    tpu.vector_store %arg3[%c32, %c0_27], %116 {strides = array<i32>} : memref<64x32xf32, #tpu.memory_space<vmem>>, vector<8x32xf32>,
    %118 = vector.extract_strided_slice %25 {offsets = [40, 0], sizes = [8, 128], strides = [1, 1]} : vector<64x128xf32> to vector<8x128xf32>
    %119 = arith.truncf %116 : vector<8x32xf32> to vector<8x32xbf16>
    %cst_28 = arith.constant dense<0.000000e+00> : vector<8x128xf32>
    %120 = tpu.matmul %119, %2, %cst_28 {dimension_numbers = #tpu.dot_dimension_numbers<[1], [0], [0], [1], [0, 0, 1, 1], [], []>} : vector<8x32xbf16>, vector<32x128xbf16>, vector<8x128xf32> -> vector<8x128xf32>
    %121 = arith.addf %118, %120 : vector<8x128xf32>
    %122 = arith.mulf %121, %18 : vector<8x128xf32>
    %123 = math.tanh %122 : vector<8x128xf32>
    %124 = arith.mulf %123, %18 : vector<8x128xf32>
    %125 = arith.addf %124, %21 : vector<8x128xf32>
    %126 = vector.extract_strided_slice %125 {offsets = [0, 0], sizes = [8, 32], strides = [1, 1]} : vector<8x128xf32> to vector<8x32xf32>
    %127 = vector.extract_strided_slice %125 {offsets = [0, 32], sizes = [8, 32], strides = [1, 1]} : vector<8x128xf32> to vector<8x32xf32>
    %128 = vector.extract_strided_slice %125 {offsets = [0, 64], sizes = [8, 32], strides = [1, 1]} : vector<8x128xf32> to vector<8x32xf32>
    %129 = vector.extract_strided_slice %125 {offsets = [0, 96], sizes = [8, 32], strides = [1, 1]} : vector<8x128xf32> to vector<8x32xf32>
    %130 = arith.mulf %127, %114 : vector<8x32xf32>
    %131 = arith.mulf %126, %128 : vector<8x32xf32>
    %132 = arith.addf %130, %131 : vector<8x32xf32>
    %133 = math.tanh %132 : vector<8x32xf32>
    %134 = arith.mulf %129, %133 : vector<8x32xf32>
    %c40_29 = arith.constant 40 : index
    %c0_30 = arith.constant 0 : index
    %135 = vector.load %arg3[%c40_29, %c0_30] : memref<64x32xf32, #tpu.memory_space<vmem>>, vector<8x32xf32>
    tpu.vector_store %arg3[%c40_29, %c0_30], %134 {strides = array<i32>} : memref<64x32xf32, #tpu.memory_space<vmem>>, vector<8x32xf32>,
    %136 = vector.extract_strided_slice %25 {offsets = [48, 0], sizes = [8, 128], strides = [1, 1]} : vector<64x128xf32> to vector<8x128xf32>
    %137 = arith.truncf %134 : vector<8x32xf32> to vector<8x32xbf16>
    %cst_31 = arith.constant dense<0.000000e+00> : vector<8x128xf32>
    %138 = tpu.matmul %137, %2, %cst_31 {dimension_numbers = #tpu.dot_dimension_numbers<[1], [0], [0], [1], [0, 0, 1, 1], [], []>} : vector<8x32xbf16>, vector<32x128xbf16>, vector<8x128xf32> -> vector<8x128xf32>
    %139 = arith.addf %136, %138 : vector<8x128xf32>
    %140 = arith.mulf %139, %18 : vector<8x128xf32>
    %141 = math.tanh %140 : vector<8x128xf32>
    %142 = arith.mulf %141, %18 : vector<8x128xf32>
    %143 = arith.addf %142, %21 : vector<8x128xf32>
    %144 = vector.extract_strided_slice %143 {offsets = [0, 0], sizes = [8, 32], strides = [1, 1]} : vector<8x128xf32> to vector<8x32xf32>
    %145 = vector.extract_strided_slice %143 {offsets = [0, 32], sizes = [8, 32], strides = [1, 1]} : vector<8x128xf32> to vector<8x32xf32>
    %146 = vector.extract_strided_slice %143 {offsets = [0, 64], sizes = [8, 32], strides = [1, 1]} : vector<8x128xf32> to vector<8x32xf32>
    %147 = vector.extract_strided_slice %143 {offsets = [0, 96], sizes = [8, 32], strides = [1, 1]} : vector<8x128xf32> to vector<8x32xf32>
    %148 = arith.mulf %145, %132 : vector<8x32xf32>
    %149 = arith.mulf %144, %146 : vector<8x32xf32>
    %150 = arith.addf %148, %149 : vector<8x32xf32>
    %151 = math.tanh %150 : vector<8x32xf32>
    %152 = arith.mulf %147, %151 : vector<8x32xf32>
    %c48 = arith.constant 48 : index
    %c0_32 = arith.constant 0 : index
    %153 = vector.load %arg3[%c48, %c0_32] : memref<64x32xf32, #tpu.memory_space<vmem>>, vector<8x32xf32>
    tpu.vector_store %arg3[%c48, %c0_32], %152 {strides = array<i32>} : memref<64x32xf32, #tpu.memory_space<vmem>>, vector<8x32xf32>,
    %154 = vector.extract_strided_slice %25 {offsets = [56, 0], sizes = [8, 128], strides = [1, 1]} : vector<64x128xf32> to vector<8x128xf32>
    %155 = arith.truncf %152 : vector<8x32xf32> to vector<8x32xbf16>
    %cst_33 = arith.constant dense<0.000000e+00> : vector<8x128xf32>
    %156 = tpu.matmul %155, %2, %cst_33 {dimension_numbers = #tpu.dot_dimension_numbers<[1], [0], [0], [1], [0, 0, 1, 1], [], []>} : vector<8x32xbf16>, vector<32x128xbf16>, vector<8x128xf32> -> vector<8x128xf32>
    %157 = arith.addf %154, %156 : vector<8x128xf32>
    %158 = arith.mulf %157, %18 : vector<8x128xf32>
    %159 = math.tanh %158 : vector<8x128xf32>
    %160 = arith.mulf %159, %18 : vector<8x128xf32>
    %161 = arith.addf %160, %21 : vector<8x128xf32>
    %162 = vector.extract_strided_slice %161 {offsets = [0, 0], sizes = [8, 32], strides = [1, 1]} : vector<8x128xf32> to vector<8x32xf32>
    %163 = vector.extract_strided_slice %161 {offsets = [0, 32], sizes = [8, 32], strides = [1, 1]} : vector<8x128xf32> to vector<8x32xf32>
    %164 = vector.extract_strided_slice %161 {offsets = [0, 64], sizes = [8, 32], strides = [1, 1]} : vector<8x128xf32> to vector<8x32xf32>
    %165 = vector.extract_strided_slice %161 {offsets = [0, 96], sizes = [8, 32], strides = [1, 1]} : vector<8x128xf32> to vector<8x32xf32>
    %166 = arith.mulf %163, %150 : vector<8x32xf32>
    %167 = arith.mulf %162, %164 : vector<8x32xf32>
    %168 = arith.addf %166, %167 : vector<8x32xf32>
    %169 = math.tanh %168 : vector<8x32xf32>
    %170 = arith.mulf %165, %169 : vector<8x32xf32>
    %c56 = arith.constant 56 : index
    %c0_34 = arith.constant 0 : index
    %171 = vector.load %arg3[%c56, %c0_34] : memref<64x32xf32, #tpu.memory_space<vmem>>, vector<8x32xf32>
    tpu.vector_store %arg3[%c56, %c0_34], %170 {strides = array<i32>} : memref<64x32xf32, #tpu.memory_space<vmem>>, vector<8x32xf32>,
    %c0_35 = arith.constant 0 : index
    %c0_36 = arith.constant 0 : index
    %172 = vector.load %arg3[%c0_35, %c0_36] : memref<64x32xf32, #tpu.memory_space<vmem>>, vector<64x32xf32>
    %cst_37 = arith.constant dense<0.000000e+00> : vector<64x128xf32>
    %173 = tpu.matmul %172, %3, %cst_37 {dimension_numbers = #tpu.dot_dimension_numbers<[1], [0], [0], [1], [0, 0, 1, 1], [], []>} : vector<64x32xf32>, vector<32x128xf32>, vector<64x128xf32> -> vector<64x128xf32>
    %174 = vector.broadcast %7 : vector<1x128xf32> to vector<64x128xf32>
    %175 = arith.addf %173, %174 : vector<64x128xf32>
    %cst_38 = arith.constant 0.000000e+00 : f32
    %176 = vector.broadcast %cst_38 : f32 to vector<8x32xf32>
    %cst_39 = arith.constant 0.000000e+00 : f32
    %177 = vector.broadcast %cst_39 : f32 to vector<8x32xf32>
    %178 = vector.extract_strided_slice %175 {offsets = [0, 0], sizes = [8, 128], strides = [1, 1]} : vector<64x128xf32> to vector<8x128xf32>
    %179 = arith.truncf %176 : vector<8x32xf32> to vector<8x32xbf16>
    %cst_40 = arith.constant dense<0.000000e+00> : vector<8x128xf32>
    %180 = tpu.matmul %179, %5, %cst_40 {dimension_numbers = #tpu.dot_dimension_numbers<[1], [0], [0], [1], [0, 0, 1, 1], [], []>} : vector<8x32xbf16>, vector<32x128xbf16>, vector<8x128xf32> -> vector<8x128xf32>
    %181 = arith.addf %178, %180 : vector<8x128xf32>
    %182 = arith.mulf %181, %18 : vector<8x128xf32>
    %183 = math.tanh %182 : vector<8x128xf32>
    %184 = arith.mulf %183, %18 : vector<8x128xf32>
    %185 = arith.addf %184, %21 : vector<8x128xf32>
    %186 = vector.extract_strided_slice %185 {offsets = [0, 0], sizes = [8, 32], strides = [1, 1]} : vector<8x128xf32> to vector<8x32xf32>
    %187 = vector.extract_strided_slice %185 {offsets = [0, 32], sizes = [8, 32], strides = [1, 1]} : vector<8x128xf32> to vector<8x32xf32>
    %188 = vector.extract_strided_slice %185 {offsets = [0, 64], sizes = [8, 32], strides = [1, 1]} : vector<8x128xf32> to vector<8x32xf32>
    %189 = vector.extract_strided_slice %185 {offsets = [0, 96], sizes = [8, 32], strides = [1, 1]} : vector<8x128xf32> to vector<8x32xf32>
    %190 = arith.mulf %187, %177 : vector<8x32xf32>
    %191 = arith.mulf %186, %188 : vector<8x32xf32>
    %192 = arith.addf %190, %191 : vector<8x32xf32>
    %193 = math.tanh %192 : vector<8x32xf32>
    %194 = arith.mulf %189, %193 : vector<8x32xf32>
    %c0_41 = arith.constant 0 : index
    %c0_42 = arith.constant 0 : index
    %195 = vector.load %arg3[%c0_41, %c0_42] : memref<64x32xf32, #tpu.memory_space<vmem>>, vector<8x32xf32>
    tpu.vector_store %arg3[%c0_41, %c0_42], %194 {strides = array<i32>} : memref<64x32xf32, #tpu.memory_space<vmem>>, vector<8x32xf32>,
    %196 = vector.extract_strided_slice %175 {offsets = [8, 0], sizes = [8, 128], strides = [1, 1]} : vector<64x128xf32> to vector<8x128xf32>
    %197 = arith.truncf %194 : vector<8x32xf32> to vector<8x32xbf16>
    %cst_43 = arith.constant dense<0.000000e+00> : vector<8x128xf32>
    %198 = tpu.matmul %197, %5, %cst_43 {dimension_numbers = #tpu.dot_dimension_numbers<[1], [0], [0], [1], [0, 0, 1, 1], [], []>} : vector<8x32xbf16>, vector<32x128xbf16>, vector<8x128xf32> -> vector<8x128xf32>
    %199 = arith.addf %196, %198 : vector<8x128xf32>
    %200 = arith.mulf %199, %18 : vector<8x128xf32>
    %201 = math.tanh %200 : vector<8x128xf32>
    %202 = arith.mulf %201, %18 : vector<8x128xf32>
    %203 = arith.addf %202, %21 : vector<8x128xf32>
    %204 = vector.extract_strided_slice %203 {offsets = [0, 0], sizes = [8, 32], strides = [1, 1]} : vector<8x128xf32> to vector<8x32xf32>
    %205 = vector.extract_strided_slice %203 {offsets = [0, 32], sizes = [8, 32], strides = [1, 1]} : vector<8x128xf32> to vector<8x32xf32>
    %206 = vector.extract_strided_slice %203 {offsets = [0, 64], sizes = [8, 32], strides = [1, 1]} : vector<8x128xf32> to vector<8x32xf32>
    %207 = vector.extract_strided_slice %203 {offsets = [0, 96], sizes = [8, 32], strides = [1, 1]} : vector<8x128xf32> to vector<8x32xf32>
    %208 = arith.mulf %205, %192 : vector<8x32xf32>
    %209 = arith.mulf %204, %206 : vector<8x32xf32>
    %210 = arith.addf %208, %209 : vector<8x32xf32>
    %211 = math.tanh %210 : vector<8x32xf32>
    %212 = arith.mulf %207, %211 : vector<8x32xf32>
    %c8_44 = arith.constant 8 : index
    %c0_45 = arith.constant 0 : index
    %213 = vector.load %arg3[%c8_44, %c0_45] : memref<64x32xf32, #tpu.memory_space<vmem>>, vector<8x32xf32>
    tpu.vector_store %arg3[%c8_44, %c0_45], %212 {strides = array<i32>} : memref<64x32xf32, #tpu.memory_space<vmem>>, vector<8x32xf32>,
    %214 = vector.extract_strided_slice %175 {offsets = [16, 0], sizes = [8, 128], strides = [1, 1]} : vector<64x128xf32> to vector<8x128xf32>
    %215 = arith.truncf %212 : vector<8x32xf32> to vector<8x32xbf16>
    %cst_46 = arith.constant dense<0.000000e+00> : vector<8x128xf32>
    %216 = tpu.matmul %215, %5, %cst_46 {dimension_numbers = #tpu.dot_dimension_numbers<[1], [0], [0], [1], [0, 0, 1, 1], [], []>} : vector<8x32xbf16>, vector<32x128xbf16>, vector<8x128xf32> -> vector<8x128xf32>
    %217 = arith.addf %214, %216 : vector<8x128xf32>
    %218 = arith.mulf %217, %18 : vector<8x128xf32>
    %219 = math.tanh %218 : vector<8x128xf32>
    %220 = arith.mulf %219, %18 : vector<8x128xf32>
    %221 = arith.addf %220, %21 : vector<8x128xf32>
    %222 = vector.extract_strided_slice %221 {offsets = [0, 0], sizes = [8, 32], strides = [1, 1]} : vector<8x128xf32> to vector<8x32xf32>
    %223 = vector.extract_strided_slice %221 {offsets = [0, 32], sizes = [8, 32], strides = [1, 1]} : vector<8x128xf32> to vector<8x32xf32>
    %224 = vector.extract_strided_slice %221 {offsets = [0, 64], sizes = [8, 32], strides = [1, 1]} : vector<8x128xf32> to vector<8x32xf32>
    %225 = vector.extract_strided_slice %221 {offsets = [0, 96], sizes = [8, 32], strides = [1, 1]} : vector<8x128xf32> to vector<8x32xf32>
    %226 = arith.mulf %223, %210 : vector<8x32xf32>
    %227 = arith.mulf %222, %224 : vector<8x32xf32>
    %228 = arith.addf %226, %227 : vector<8x32xf32>
    %229 = math.tanh %228 : vector<8x32xf32>
    %230 = arith.mulf %225, %229 : vector<8x32xf32>
    %c16_47 = arith.constant 16 : index
    %c0_48 = arith.constant 0 : index
    %231 = vector.load %arg3[%c16_47, %c0_48] : memref<64x32xf32, #tpu.memory_space<vmem>>, vector<8x32xf32>
    tpu.vector_store %arg3[%c16_47, %c0_48], %230 {strides = array<i32>} : memref<64x32xf32, #tpu.memory_space<vmem>>, vector<8x32xf32>,
    %232 = vector.extract_strided_slice %175 {offsets = [24, 0], sizes = [8, 128], strides = [1, 1]} : vector<64x128xf32> to vector<8x128xf32>
    %233 = arith.truncf %230 : vector<8x32xf32> to vector<8x32xbf16>
    %cst_49 = arith.constant dense<0.000000e+00> : vector<8x128xf32>
    %234 = tpu.matmul %233, %5, %cst_49 {dimension_numbers = #tpu.dot_dimension_numbers<[1], [0], [0], [1], [0, 0, 1, 1], [], []>} : vector<8x32xbf16>, vector<32x128xbf16>, vector<8x128xf32> -> vector<8x128xf32>
    %235 = arith.addf %232, %234 : vector<8x128xf32>
    %236 = arith.mulf %235, %18 : vector<8x128xf32>
    %237 = math.tanh %236 : vector<8x128xf32>
    %238 = arith.mulf %237, %18 : vector<8x128xf32>
    %239 = arith.addf %238, %21 : vector<8x128xf32>
    %240 = vector.extract_strided_slice %239 {offsets = [0, 0], sizes = [8, 32], strides = [1, 1]} : vector<8x128xf32> to vector<8x32xf32>
    %241 = vector.extract_strided_slice %239 {offsets = [0, 32], sizes = [8, 32], strides = [1, 1]} : vector<8x128xf32> to vector<8x32xf32>
    %242 = vector.extract_strided_slice %239 {offsets = [0, 64], sizes = [8, 32], strides = [1, 1]} : vector<8x128xf32> to vector<8x32xf32>
    %243 = vector.extract_strided_slice %239 {offsets = [0, 96], sizes = [8, 32], strides = [1, 1]} : vector<8x128xf32> to vector<8x32xf32>
    %244 = arith.mulf %241, %228 : vector<8x32xf32>
    %245 = arith.mulf %240, %242 : vector<8x32xf32>
    %246 = arith.addf %244, %245 : vector<8x32xf32>
    %247 = math.tanh %246 : vector<8x32xf32>
    %248 = arith.mulf %243, %247 : vector<8x32xf32>
    %c24_50 = arith.constant 24 : index
    %c0_51 = arith.constant 0 : index
    %249 = vector.load %arg3[%c24_50, %c0_51] : memref<64x32xf32, #tpu.memory_space<vmem>>, vector<8x32xf32>
    tpu.vector_store %arg3[%c24_50, %c0_51], %248 {strides = array<i32>} : memref<64x32xf32, #tpu.memory_space<vmem>>, vector<8x32xf32>,
    %250 = vector.extract_strided_slice %175 {offsets = [32, 0], sizes = [8, 128], strides = [1, 1]} : vector<64x128xf32> to vector<8x128xf32>
    %251 = arith.truncf %248 : vector<8x32xf32> to vector<8x32xbf16>
    %cst_52 = arith.constant dense<0.000000e+00> : vector<8x128xf32>
    %252 = tpu.matmul %251, %5, %cst_52 {dimension_numbers = #tpu.dot_dimension_numbers<[1], [0], [0], [1], [0, 0, 1, 1], [], []>} : vector<8x32xbf16>, vector<32x128xbf16>, vector<8x128xf32> -> vector<8x128xf32>
    %253 = arith.addf %250, %252 : vector<8x128xf32>
    %254 = arith.mulf %253, %18 : vector<8x128xf32>
    %255 = math.tanh %254 : vector<8x128xf32>
    %256 = arith.mulf %255, %18 : vector<8x128xf32>
    %257 = arith.addf %256, %21 : vector<8x128xf32>
    %258 = vector.extract_strided_slice %257 {offsets = [0, 0], sizes = [8, 32], strides = [1, 1]} : vector<8x128xf32> to vector<8x32xf32>
    %259 = vector.extract_strided_slice %257 {offsets = [0, 32], sizes = [8, 32], strides = [1, 1]} : vector<8x128xf32> to vector<8x32xf32>
    %260 = vector.extract_strided_slice %257 {offsets = [0, 64], sizes = [8, 32], strides = [1, 1]} : vector<8x128xf32> to vector<8x32xf32>
    %261 = vector.extract_strided_slice %257 {offsets = [0, 96], sizes = [8, 32], strides = [1, 1]} : vector<8x128xf32> to vector<8x32xf32>
    %262 = arith.mulf %259, %246 : vector<8x32xf32>
    %263 = arith.mulf %258, %260 : vector<8x32xf32>
    %264 = arith.addf %262, %263 : vector<8x32xf32>
    %265 = math.tanh %264 : vector<8x32xf32>
    %266 = arith.mulf %261, %265 : vector<8x32xf32>
    %c32_53 = arith.constant 32 : index
    %c0_54 = arith.constant 0 : index
    %267 = vector.load %arg3[%c32_53, %c0_54] : memref<64x32xf32, #tpu.memory_space<vmem>>, vector<8x32xf32>
    tpu.vector_store %arg3[%c32_53, %c0_54], %266 {strides = array<i32>} : memref<64x32xf32, #tpu.memory_space<vmem>>, vector<8x32xf32>,
    %268 = vector.extract_strided_slice %175 {offsets = [40, 0], sizes = [8, 128], strides = [1, 1]} : vector<64x128xf32> to vector<8x128xf32>
    %269 = arith.truncf %266 : vector<8x32xf32> to vector<8x32xbf16>
    %cst_55 = arith.constant dense<0.000000e+00> : vector<8x128xf32>
    %270 = tpu.matmul %269, %5, %cst_55 {dimension_numbers = #tpu.dot_dimension_numbers<[1], [0], [0], [1], [0, 0, 1, 1], [], []>} : vector<8x32xbf16>, vector<32x128xbf16>, vector<8x128xf32> -> vector<8x128xf32>
    %271 = arith.addf %268, %270 : vector<8x128xf32>
    %272 = arith.mulf %271, %18 : vector<8x128xf32>
    %273 = math.tanh %272 : vector<8x128xf32>
    %274 = arith.mulf %273, %18 : vector<8x128xf32>
    %275 = arith.addf %274, %21 : vector<8x128xf32>
    %276 = vector.extract_strided_slice %275 {offsets = [0, 0], sizes = [8, 32], strides = [1, 1]} : vector<8x128xf32> to vector<8x32xf32>
    %277 = vector.extract_strided_slice %275 {offsets = [0, 32], sizes = [8, 32], strides = [1, 1]} : vector<8x128xf32> to vector<8x32xf32>
    %278 = vector.extract_strided_slice %275 {offsets = [0, 64], sizes = [8, 32], strides = [1, 1]} : vector<8x128xf32> to vector<8x32xf32>
    %279 = vector.extract_strided_slice %275 {offsets = [0, 96], sizes = [8, 32], strides = [1, 1]} : vector<8x128xf32> to vector<8x32xf32>
    %280 = arith.mulf %277, %264 : vector<8x32xf32>
    %281 = arith.mulf %276, %278 : vector<8x32xf32>
    %282 = arith.addf %280, %281 : vector<8x32xf32>
    %283 = math.tanh %282 : vector<8x32xf32>
    %284 = arith.mulf %279, %283 : vector<8x32xf32>
    %c40_56 = arith.constant 40 : index
    %c0_57 = arith.constant 0 : index
    %285 = vector.load %arg3[%c40_56, %c0_57] : memref<64x32xf32, #tpu.memory_space<vmem>>, vector<8x32xf32>
    tpu.vector_store %arg3[%c40_56, %c0_57], %284 {strides = array<i32>} : memref<64x32xf32, #tpu.memory_space<vmem>>, vector<8x32xf32>,
    %286 = vector.extract_strided_slice %175 {offsets = [48, 0], sizes = [8, 128], strides = [1, 1]} : vector<64x128xf32> to vector<8x128xf32>
    %287 = arith.truncf %284 : vector<8x32xf32> to vector<8x32xbf16>
    %cst_58 = arith.constant dense<0.000000e+00> : vector<8x128xf32>
    %288 = tpu.matmul %287, %5, %cst_58 {dimension_numbers = #tpu.dot_dimension_numbers<[1], [0], [0], [1], [0, 0, 1, 1], [], []>} : vector<8x32xbf16>, vector<32x128xbf16>, vector<8x128xf32> -> vector<8x128xf32>
    %289 = arith.addf %286, %288 : vector<8x128xf32>
    %290 = arith.mulf %289, %18 : vector<8x128xf32>
    %291 = math.tanh %290 : vector<8x128xf32>
    %292 = arith.mulf %291, %18 : vector<8x128xf32>
    %293 = arith.addf %292, %21 : vector<8x128xf32>
    %294 = vector.extract_strided_slice %293 {offsets = [0, 0], sizes = [8, 32], strides = [1, 1]} : vector<8x128xf32> to vector<8x32xf32>
    %295 = vector.extract_strided_slice %293 {offsets = [0, 32], sizes = [8, 32], strides = [1, 1]} : vector<8x128xf32> to vector<8x32xf32>
    %296 = vector.extract_strided_slice %293 {offsets = [0, 64], sizes = [8, 32], strides = [1, 1]} : vector<8x128xf32> to vector<8x32xf32>
    %297 = vector.extract_strided_slice %293 {offsets = [0, 96], sizes = [8, 32], strides = [1, 1]} : vector<8x128xf32> to vector<8x32xf32>
    %298 = arith.mulf %295, %282 : vector<8x32xf32>
    %299 = arith.mulf %294, %296 : vector<8x32xf32>
    %300 = arith.addf %298, %299 : vector<8x32xf32>
    %301 = math.tanh %300 : vector<8x32xf32>
    %302 = arith.mulf %297, %301 : vector<8x32xf32>
    %c48_59 = arith.constant 48 : index
    %c0_60 = arith.constant 0 : index
    %303 = vector.load %arg3[%c48_59, %c0_60] : memref<64x32xf32, #tpu.memory_space<vmem>>, vector<8x32xf32>
    tpu.vector_store %arg3[%c48_59, %c0_60], %302 {strides = array<i32>} : memref<64x32xf32, #tpu.memory_space<vmem>>, vector<8x32xf32>,
    %304 = vector.extract_strided_slice %175 {offsets = [56, 0], sizes = [8, 128], strides = [1, 1]} : vector<64x128xf32> to vector<8x128xf32>
    %305 = arith.truncf %302 : vector<8x32xf32> to vector<8x32xbf16>
    %cst_61 = arith.constant dense<0.000000e+00> : vector<8x128xf32>
    %306 = tpu.matmul %305, %5, %cst_61 {dimension_numbers = #tpu.dot_dimension_numbers<[1], [0], [0], [1], [0, 0, 1, 1], [], []>} : vector<8x32xbf16>, vector<32x128xbf16>, vector<8x128xf32> -> vector<8x128xf32>
    %307 = arith.addf %304, %306 : vector<8x128xf32>
    %308 = arith.mulf %307, %18 : vector<8x128xf32>
    %309 = math.tanh %308 : vector<8x128xf32>
    %310 = arith.mulf %309, %18 : vector<8x128xf32>
    %311 = arith.addf %310, %21 : vector<8x128xf32>
    %312 = vector.extract_strided_slice %311 {offsets = [0, 0], sizes = [8, 32], strides = [1, 1]} : vector<8x128xf32> to vector<8x32xf32>
    %313 = vector.extract_strided_slice %311 {offsets = [0, 32], sizes = [8, 32], strides = [1, 1]} : vector<8x128xf32> to vector<8x32xf32>
    %314 = vector.extract_strided_slice %311 {offsets = [0, 64], sizes = [8, 32], strides = [1, 1]} : vector<8x128xf32> to vector<8x32xf32>
    %315 = vector.extract_strided_slice %311 {offsets = [0, 96], sizes = [8, 32], strides = [1, 1]} : vector<8x128xf32> to vector<8x32xf32>
    %316 = arith.mulf %313, %300 : vector<8x32xf32>
    %317 = arith.mulf %312, %314 : vector<8x32xf32>
    %318 = arith.addf %316, %317 : vector<8x32xf32>
    %319 = math.tanh %318 : vector<8x32xf32>
    %320 = arith.mulf %315, %319 : vector<8x32xf32>
    %c56_62 = arith.constant 56 : index
    %c0_63 = arith.constant 0 : index
    %321 = vector.load %arg3[%c56_62, %c0_63] : memref<64x32xf32, #tpu.memory_space<vmem>>, vector<8x32xf32>
    tpu.vector_store %arg3[%c56_62, %c0_63], %320 {strides = array<i32>} : memref<64x32xf32, #tpu.memory_space<vmem>>, vector<8x32xf32>,
    %c0_64 = arith.constant 0 : index
    %c0_65 = arith.constant 0 : index
    %322 = vector.load %arg3[%c0_64, %c0_65] : memref<64x32xf32, #tpu.memory_space<vmem>>, vector<64x32xf32>
    %cst_66 = arith.constant 0.000000e+00 : f32
    %323 = vector.broadcast %cst_66 : f32 to vector<64x32xf32>
    %324 = arith.maximumf %322, %323 : vector<64x32xf32>
    %cst_67 = arith.constant dense<0.000000e+00> : vector<64x128xf32>
    %325 = tpu.matmul %324, %8, %cst_67 {dimension_numbers = #tpu.dot_dimension_numbers<[1], [0], [0], [1], [0, 0, 1, 1], [], []>} : vector<64x32xf32>, vector<32x128xf32>, vector<64x128xf32> -> vector<64x128xf32>
    %326 = vector.broadcast %9 : vector<1x128xf32> to vector<64x128xf32>
    %327 = arith.addf %325, %326 : vector<64x128xf32>
    %328 = math.exp %327 : vector<64x128xf32>
    %cst_68 = arith.constant dense<0.000000e+00> : vector<64xf32>
    %329 = vector.multi_reduction <add>, %328, %cst_68 [1] : vector<64x128xf32> to vector<64xf32>
    %330 = vector.shape_cast %329 : vector<64xf32> to vector<64x1xf32>
    %331 = tpu.reciprocal %330 {approx = true} : vector<64x1xf32> -> vector<64x1xf32>
    %332 = vector.broadcast %331 : vector<64x1xf32> to vector<64x128xf32>
    %333 = arith.mulf %328, %332 : vector<64x128xf32>
    %c0_69 = arith.constant 0 : index
    %c0_70 = arith.constant 0 : index
    %334 = vector.load %arg2[%c0_69, %c0_70] : memref<64x128xf32, #tpu.memory_space<vmem>>, vector<64x128xf32>
    tpu.vector_store %arg2[%c0_69, %c0_70], %333 {strides = array<i32>} : memref<64x128xf32, #tpu.memory_space<vmem>>, vector<64x128xf32>,
    return
  }
}

</mosaic_0001>

<bundles_post_ra>
// kernel: lstm_igt_forward.1
= control target key start
LH: loop header
LB: loop body
LE: loop exit
PB: predicated region body
PF: predicated region fallthrough
CT: control target
= control target key end

     0   :  { %7 = vsyncpa [#allocation4], 0  ;;  %s2175_s9 = smov [#allocation3]   ;;  %s2665_s0 = inlined_call_operand.vmem [shape: f32[64,8], index: 0, kind: input, shape index: {}]   ;;  %s2666_s1 = inlined_call_operand.hbm [shape: f32[152,128], index: 1, kind: input, shape index: {}]   ;;  %s2667_s2 = inlined_call_operand.vmem [shape: f32[64,128], index: 2, kind: output, shape index: {}]  }
   0x1   :  { %s15_s10 = sshll.u32 %s2175_s9, 4  ;;  %s2151_s13 = scalar_lea.hbm %s2666_s1, 2432  ;;  %s16_s10 = int_to_ptr.vmem [resolvable:$true] %s15_s10 }
   0x2   :  { %p2152_p0 = scmp.ne.s32.totalorder %s2666_s1, %s2151_s13  ;;  %p2155_p1 = scmp.lt.u32.totalorder %s2151_s13, %s2666_s1 }
   0x4   :  { %p2157_p2 = pnand %p2155_p1, %p2152_p0 }
   0x6   :  { %2160 = shalt.err (!%p2157_p2)
}
   0x7   :  { %s2161_s18 = scalar_lea.vmem %s16_s10, 2432  ;;  %p2166_p4 = scmp.lt.s32.totalorder %s16_s10, %s16_s10 }
   0x8   :  { %p2162_p3 = scmp.ne.s32.totalorder %s16_s10, %s2161_s18  ;;  %p2167_p5 = scmp.lt.s32.totalorder %s2161_s18, %s2161_s18 }
   0xa   :  { %p2168_p6 = por %p2167_p5, %p2166_p4 }
   0xc   :  { %p2169_p7 = pnand %p2168_p6, %p2162_p3 }
   0xe   :  { %2172 = shalt.err (!%p2169_p7)
}
   0xf   :  { %s2176_s19 = smov 128   ;;  %s2177_s20 = smov 8  }
  0x10   :  { %21 = dma.hbm_to_vmem [thread:$0]  %s2666_s1, 2432, %s16_s10, [#allocation4], %s2176_s19, %s2176_s19, %s2177_s20  }
  0x11   :  { %2173 = dma.done.wait [#allocation4], 2432  }
  0x12   :  { %2174 = vsyncadd [#allocation4], 4294964864  ;;  %vm69_vm0 = vcmask 64512   ;;  %v26_v0 = vld [vmem:[#allocation3] sm:$0xff]  ;;  %v62_v2 = vld [vmem:[%s2665_s0 + $0x28] sm:$0xff]  ;;  %v2178_v8 = vmov 0.0   ;;  %v50_v15 = vlaneseq }
  0x13   :  { %v61_v1 = vld [vmem:[%s2665_s0 + $0x20] sm:$0xff]  ;;  %2044 = vmatprep.subr.mxu1 %v26_v0  ;;  %v27_v3 = vld [vmem:[#allocation3 + $0x8] sm:$0xff]  ;;  %v28_v4 = vld [vmem:[#allocation3 + $0x10] sm:$0xff]  ;;  %1846 = vmatprep.subr.mxu0 %v26_v0  ;;  %vm2179_vm1 = vmmov 0   ;;  %v2180_v14 = vmov 0   ;;  %v2181_v25 = vmov 0.5  }
  0x14   :  { %1854 = vmatprep.mubr.msk.f32.mxu1 %vm69_vm0, %v61_v1  ;;  %v63_v5 = vld [vmem:[%s2665_s0 + $0x30] sm:$0xff]  ;;  %2045 = vmatpush3.msra.mxu1 %v26_v0  ;;  %v2221_v6 = vpack.c.bf16 %v28_v4, %v27_v3  ;;  %v57_v7 = vld [vmem:[%s2665_s0] sm:$0xff]  ;;  %v58_v9 = vld [vmem:[%s2665_s0 + $0x8] sm:$0xff]  ;;  %v51_v16 = vand.u32 127, %v50_v15  ;;  %s2182_s6 = smov 64   ;;  %s2183_s7 = smov 32  }
  0x15   :  { %1855 = vmatmul.mubr.msk.f32.vlgmr.msra.gmra.mrb[0].mxu1 %vm69_vm0, %v62_v2  ;;  %1860 = vmatprep.subr.bf16.mxu1 %v2178_v8  ;;  %v29_v10 = vld [vmem:[#allocation3 + $0x18] sm:$0xff]  ;;  %v30_v11 = vld [vmem:[#allocation3 + $0x20] sm:$0xff]  ;;  %v2262_v20 = vld [vmem:[#allocation3 + $0x68] ss:$0 sm:$0xff]  ;;  %vm199_vm5 = vcmask 261120  }
  0x16   :  { %1861 = vmatpush3.bf16.msra.mxu1 %v2221_v6  ;;  %1857 = vmatprep.mubr.msk.f32.mxu1 %vm69_vm0, %v63_v5  ;;  %v64_v12 = vld [vmem:[%s2665_s0 + $0x38] sm:$0xff]  ;;  %v2236_v13 = vpack.c.bf16 %v30_v11, %v29_v10  ;;  %vm52_vm2 = vcmp.ge.s32.totalorder %v51_v16, 64  ;;  %vm53_vm3 = vcmp.lt.s32.totalorder %v51_v16, 96  ;;  %v59_v62 = vld [vmem:[%s2665_s0 + $0x10] sm:$0xff] }
  0x17   :  { %1847 = vmatpush3.msra.mxu0 %v26_v0  ;;  %1848 = vmatprep.mubr.msk.f32.mxu0 %vm69_vm0, %v57_v7  ;;  %vm54_vm4 = vmand %vm52_vm2, %vm53_vm3  ;;  %v60_v63 = vld [vmem:[%s2665_s0 + $0x18] sm:$0xff] }
  0x18   :  { %1862 = vmatprep.subr.bf16.mxu1 %v2178_v8  ;;  %1849 = vmatmul.mubr.msk.f32.vlgmr.msra.gmra.mrb[0].mxu0 %vm69_vm0, %v58_v9  ;;  %v2269_v26 = vsel %vm54_vm4, 1.0, %v2181_v25  ;;  %v2272_v34 = vsel %vm54_vm4, 0.0, %v2181_v25 }
  0x19   :  { %1858 = vmatmul.mubr.msk.f32.gmra.mrb[2].mxu1 %vm69_vm0, %v64_v12  ;;  %1876 = vmatprep.subr.bf16.mxu0 %v2178_v8 }
  0x1a   :  { %1863 = vmatpush3.bf16.msra.mxu1 %v2236_v13  ;;  %1864 = vmatprep.mubr.msk.bf16.mxu1 %vm2179_vm1, %v2178_v8 }
  0x1b   :  { %1868 = vmatprep.subr.bf16.mxu1 %v2178_v8  ;;  %1877 = vmatpush3.bf16.msra.mxu0 %v2221_v6 }
  0x1c   :  { %1878 = vmatprep.subr.bf16.mxu0 %v2178_v8  ;;  %1851 = vmatprep.mubr.msk.f32.mxu0 %vm69_vm0, %v59_v62 }
  0x1d   :  { %1865 = vmatmul.mubr.bf16.vlgmr.msra.gmra.mrb[4].mxu1 %v2180_v14  ;;  %1852 = vmatmul.mubr.msk.f32.gmra.mrb[2].mxu0 %vm69_vm0, %v60_v63 }
  0x1e   :  { %1869 = vmatpush3.bf16.msra.mxu1 %v2221_v6  ;;  %1872 = vmatprep.mubr.msk.bf16.mxu1 %vm2179_vm1, %v2178_v8 }
  0x1f   :  { %1870 = vmatprep.subr.bf16.mxu1 %v2178_v8  ;;  %1879 = vmatpush3.bf16.msra.mxu0 %v2236_v13 }
  0x20   :  { %1892 = vmatprep.subr.bf16.mxu0 %v2178_v8  ;;  %1880 = vmatprep.mubr.msk.bf16.mxu0 %vm2179_vm1, %v2178_v8 }
  0x22   :  { %1871 = vmatpush3.bf16.msra.mxu1 %v2236_v13 }
  0x23   :  { %1884 = vmatprep.subr.bf16.mxu1 %v2178_v8 }
  0xe8   :  { %v2258_v17 = vpop.f32.mrb[0].mxu1 }
  0xe9   :  { %v2260_v18 = vpop.f32.mrb[1].mxu1 }
  0xeb   :  { %v1850_v19 = vpop.f32.mrb[0].mxu0 }
  0xec   :  { %v2264_v21 = vpop.f32.mrb[2].mxu1  ;;  %v160_v22 = vpop.f32.mrb[1].mxu0  ;;  %v166_v47 = vadd.f32 %v1850_v19, %v2262_v20 }
  0xed   :  { %v2266_v23 = vpop.f32.mrb[3].mxu1  ;;  %v161_v24 = vadd.f32 %v2262_v20, %v160_v22 }
  0xf0   :  { %v237_v27 = vpop.f32.mrb[4].mxu1  ;;  %v1853_v4 = vpop.f32.mrb[2].mxu0 }
  0xf1   :  { %v243_v28 = vadd.f32 %v237_v27, %v161_v24  ;;  %v1866_v29 = vpop.f32.mrb[5].mxu1  ;;  %v170_v5 = vpop.f32.mrb[3].mxu0 }
  0xf2   :  { %v240_v30 = vpop.f32.mrb[6].mxu1  ;;  %v171_v9 = vadd.f32 %v2262_v20, %v170_v5 }
  0xf3   :  { %v244_v31 = vmul.f32 %v243_v28, %v2269_v26  ;;  %v1867_v32 = vpop.f32.mrb[7].mxu1 }
  0xf5   :  { %2055 = vtanh.f32 %v244_v31 }
  0xff   :  { %v2056_v33 = vpop.eup %2055 }
 0x100   :  { %v246_v35 = vmul.f32 %v2056_v33, %v2269_v26 }
 0x102   :  { %v247_v36 = vadd.f32 %v246_v35, %v2272_v34 }
 0x104   :  { %250 = vrot.lane.b32.xlu0 %v247_v36, %s2182_s6  ;;  %v248_v39 = vmul.f32 0.0, %v247_v36 }
 0x176   :  { %v251_v37 = vpop.permute.xlu0 %250 }
 0x177   :  { %v253_v38 = vmul.f32 %v251_v37, %v247_v36 }
 0x179   :  { %255 = vrot.lane.b32.xlu0 %v253_v38, %s2183_s7  ;;  %v176_v38 = vadd.f32 %v1853_v4, %v2262_v20 }
 0x1eb   :  { %v256_v40 = vpop.permute.xlu0 %255 }
 0x1ec   :  { %v258_v41 = vadd.f32 %v256_v40, %v248_v39 }
 0x1ee   :  { %2057 = vtanh.f32 %v258_v41 }
 0x1f8   :  { %v2058_v42 = vpop.eup %2057 }
 0x1f9   :  { %261 = vrot.lane.b32.xlu1 %v2058_v42, %s2182_s6 }
 0x26b   :  { %v262_v43 = vpop.permute.xlu1 %261 }
 0x26c   :  { %v2279_v44 = vmul.f32 %v262_v43, %v247_v36 }
 0x26e   :  { %v270_v45 = vpack.c.bf16 %v2279_v44, %v2279_v44 }
 0x270   :  { %272 = vrot.lane.b32.xlu1 %v270_v45, %s2183_s7 }
 0x2e2   :  { %v273_v46 = vpop.permute.xlu1 %272 }
 0x2e3   :  { %1873 = vmatmul.mubr.msk.bf16.vlgmr.msra.gmra.mrb[8].mxu1 %vm199_vm5, %v273_v46 }
 0x2e4   :  { %1885 = vmatpush3.bf16.msra.mxu1 %v2221_v6  ;;  %1888 = vmatprep.mubr.msk.bf16.mxu1 %vm2179_vm1, %v2178_v8 }
 0x2e5   :  { %1886 = vmatprep.subr.bf16.mxu1 %v2178_v8 }
 0x2e8   :  { %1887 = vmatpush3.bf16.msra.mxu1 %v2236_v13 }
 0x2e9   :  { %1900 = vmatprep.subr.bf16.mxu1 %v2178_v8 }
 0x3b6   :  { %v311_v48 = vpop.f32.mrb[8].mxu1 }
 0x3b7   :  { %v317_v49 = vadd.f32 %v311_v48, %v166_v47  ;;  %v1874_v50 = vpop.f32.mrb[9].mxu1 }
 0x3b8   :  { %v314_v51 = vpop.f32.mrb[10].mxu1 }
 0x3b9   :  { %v318_v52 = vmul.f32 %v317_v49, %v2269_v26  ;;  %v1875_v53 = vpop.f32.mrb[11].mxu1 }
 0x3bb   :  { %2059 = vtanh.f32 %v318_v52 }
 0x3c5   :  { %v2060_v54 = vpop.eup %2059 }
 0x3c6   :  { %v320_v55 = vmul.f32 %v2060_v54, %v2269_v26 }
 0x3c8   :  { %v321_v56 = vadd.f32 %v320_v55, %v2272_v34 }
 0x3ca   :  { %324 = vrot.lane.b32.xlu0 %v321_v56, %s2182_s6  ;;  %v322_v59 = vmul.f32 %v321_v56, %v258_v41 }
 0x43c   :  { %v325_v57 = vpop.permute.xlu0 %324 }
 0x43d   :  { %v327_v58 = vmul.f32 %v325_v57, %v321_v56 }
 0x43f   :  { %329 = vrot.lane.b32.xlu1 %v327_v58, %s2183_s7 }
 0x4b1   :  { %v330_v60 = vpop.permute.xlu1 %329 }
 0x4b2   :  { %v332_v61 = vadd.f32 %v330_v60, %v322_v59  ;;  %v181_v59 = vadd.f32 %v2262_v20, %v2260_v18 }
 0x4b4   :  { %2061 = vtanh.f32 %v332_v61 }
 0x4be   :  { %v2062_v0 = vpop.eup %2061 }
 0x4bf   :  { %335 = vrot.lane.b32.xlu0 %v2062_v0, %s2182_s6 }
 0x531   :  { %v336_v1 = vpop.permute.xlu0 %335 }
 0x532   :  { %v2308_v2 = vmul.f32 %v336_v1, %v321_v56 }
 0x534   :  { %v344_v3 = vpack.c.bf16 %v2308_v2, %v2308_v2 }
 0x536   :  { %346 = vrot.lane.b32.xlu1 %v344_v3, %s2183_s7 }
 0x5a8   :  { %v347_v7 = vpop.permute.xlu1 %346 }
 0x5a9   :  { %1881 = vmatmul.mubr.msk.bf16.vlgmr.msra.gmra.mrb[4].mxu0 %vm199_vm5, %v347_v7 }
 0x5aa   :  { %1893 = vmatpush3.bf16.msra.mxu0 %v2221_v6  ;;  %1896 = vmatprep.mubr.msk.bf16.mxu0 %vm2179_vm1, %v2178_v8 }
 0x5ab   :  { %1894 = vmatprep.subr.bf16.mxu0 %v2178_v8 }
 0x5ae   :  { %1895 = vmatpush3.bf16.msra.mxu0 %v2236_v13 }
 0x5af   :  { %1908 = vmatprep.subr.bf16.mxu0 %v2178_v8 }
 0x67c   :  { %v385_v10 = vpop.f32.mrb[4].mxu0 }
 0x67d   :  { %v391_v11 = vadd.f32 %v385_v10, %v171_v9  ;;  %v1882_v12 = vpop.f32.mrb[5].mxu0 }
 0x67e   :  { %v388_v15 = vpop.f32.mrb[6].mxu0 }
 0x67f   :  { %v392_v16 = vmul.f32 %v391_v11, %v2269_v26  ;;  %v1883_v19 = vpop.f32.mrb[7].mxu0 }
 0x681   :  { %2063 = vtanh.f32 %v392_v16 }
 0x68b   :  { %v2064_v22 = vpop.eup %2063 }
 0x68c   :  { %v394_v24 = vmul.f32 %v2064_v22, %v2269_v26 }
 0x68e   :  { %v395_v25 = vadd.f32 %v394_v24, %v2272_v34  ;;  %v186_v24 = vadd.f32 %v2258_v17, %v2262_v20 }
 0x690   :  { %398 = vrot.lane.b32.xlu0 %v395_v25, %s2182_s6  ;;  %v396_v29 = vmul.f32 %v395_v25, %v332_v61 }
 0x702   :  { %v399_v27 = vpop.permute.xlu0 %398 }
 0x703   :  { %v401_v28 = vmul.f32 %v399_v27, %v395_v25 }
 0x705   :  { %403 = vrot.lane.b32.xlu1 %v401_v28, %s2183_s7 }
 0x777   :  { %v404_v30 = vpop.permute.xlu1 %403 }
 0x778   :  { %v406_v31 = vadd.f32 %v404_v30, %v396_v29 }
 0x77a   :  { %2065 = vtanh.f32 %v406_v31 }
 0x784   :  { %v2066_v32 = vpop.eup %2065 }
 0x785   :  { %409 = vrot.lane.b32.xlu0 %v2066_v32, %s2182_s6 }
 0x7f7   :  { %v410_v33 = vpop.permute.xlu0 %409 }
 0x7f8   :  { %v2327_v35 = vmul.f32 %v410_v33, %v395_v25 }
 0x7fa   :  { %v418_v36 = vpack.c.bf16 %v2327_v35, %v2327_v35 }
 0x7fc   :  { %420 = vrot.lane.b32.xlu1 %v418_v36, %s2183_s7 }
 0x86e   :  { %v421_v37 = vpop.permute.xlu1 %420 }
 0x86f   :  { %1889 = vmatmul.mubr.msk.bf16.vlgmr.msra.gmra.mrb[12].mxu1 %vm199_vm5, %v421_v37 }
 0x870   :  { %1901 = vmatpush3.bf16.msra.mxu1 %v2221_v6  ;;  %1904 = vmatprep.mubr.msk.bf16.mxu1 %vm2179_vm1, %v2178_v8 }
 0x871   :  { %1902 = vmatprep.subr.bf16.mxu1 %v2178_v8 }
 0x874   :  { %1903 = vmatpush3.bf16.msra.mxu1 %v2236_v13 }
 0x875   :  { %1916 = vmatprep.subr.bf16.mxu1 %v2178_v8 }
 0x942   :  { %v459_v39 = vpop.f32.mrb[12].mxu1 }
 0x943   :  { %v465_v40 = vadd.f32 %v459_v39, %v176_v38  ;;  %v1890_v41 = vpop.f32.mrb[13].mxu1 }
 0x944   :  { %v462_v42 = vpop.f32.mrb[14].mxu1 }
 0x945   :  { %v466_v43 = vmul.f32 %v465_v40, %v2269_v26  ;;  %v1891_v45 = vpop.f32.mrb[15].mxu1 }
 0x946   :  { %v191_v45 = vadd.f32 %v2262_v20, %v2266_v23 }
 0x947   :  { %2067 = vtanh.f32 %v466_v43 }
 0x951   :  { %v2068_v46 = vpop.eup %2067 }
 0x952   :  { %v468_v47 = vmul.f32 %v2068_v46, %v2269_v26 }
 0x954   :  { %v469_v48 = vadd.f32 %v468_v47, %v2272_v34 }
 0x956   :  { %472 = vrot.lane.b32.xlu0 %v469_v48, %s2182_s6  ;;  %v470_v51 = vmul.f32 %v469_v48, %v406_v31 }
 0x9c8   :  { %v473_v49 = vpop.permute.xlu0 %472 }
 0x9c9   :  { %v475_v50 = vmul.f32 %v473_v49, %v469_v48 }
 0x9cb   :  { %477 = vrot.lane.b32.xlu1 %v475_v50, %s2183_s7 }
 0xa3d   :  { %v478_v52 = vpop.permute.xlu1 %477 }
 0xa3e   :  { %v480_v53 = vadd.f32 %v478_v52, %v470_v51 }
 0xa40   :  { %2069 = vtanh.f32 %v480_v53 }
 0xa4a   :  { %v2070_v54 = vpop.eup %2069 }
 0xa4b   :  { %483 = vrot.lane.b32.xlu0 %v2070_v54, %s2182_s6 }
 0xabd   :  { %v484_v55 = vpop.permute.xlu0 %483 }
 0xabe   :  { %v2346_v56 = vmul.f32 %v484_v55, %v469_v48 }
 0xac0   :  { %v492_v57 = vpack.c.bf16 %v2346_v56, %v2346_v56 }
 0xac2   :  { %494 = vrot.lane.b32.xlu1 %v492_v57, %s2183_s7 }
 0xb34   :  { %v495_v58 = vpop.permute.xlu1 %494 }
 0xb35   :  { %1897 = vmatmul.mubr.msk.bf16.vlgmr.msra.gmra.mrb[8].mxu0 %vm199_vm5, %v495_v58 }
 0xb36   :  { %1909 = vmatpush3.bf16.msra.mxu0 %v2221_v6  ;;  %1912 = vmatprep.mubr.msk.bf16.mxu0 %vm2179_vm1, %v2178_v8 }
 0xb37   :  { %1910 = vmatprep.subr.bf16.mxu0 %v2178_v8 }
 0xb3a   :  { %1911 = vmatpush3.bf16.msra.mxu0 %v2236_v13 }
 0xc08   :  { %v533_v60 = vpop.f32.mrb[8].mxu0 }
 0xc09   :  { %v539_v61 = vadd.f32 %v533_v60, %v181_v59  ;;  %v1898_v62 = vpop.f32.mrb[9].mxu0  ;;  %v33_v60 = vld [vmem:[#allocation3 + $0x28] sm:$0xff] }
 0xc0a   :  { %v536_v63 = vpop.f32.mrb[10].mxu0 }
 0xc0b   :  { %v540_v0 = vmul.f32 %v539_v61, %v2269_v26  ;;  %v1899_v1 = vpop.f32.mrb[11].mxu0  ;;  %v34_v61 = vld [vmem:[#allocation3 + $0x30] sm:$0xff] }
 0xc0c   :  { %v2028_v62 = vpack.c.bf16 %v34_v61, %v33_v60  ;;  %v36_v1 = vld [vmem:[#allocation3 + $0x40] sm:$0xff] }
 0xc0d   :  { %2071 = vtanh.f32 %v540_v0  ;;  %v35_v0 = vld [vmem:[#allocation3 + $0x38] sm:$0xff] }
 0xc0e   :  { %2029 = vmatprep.subr.bf16.mxu0 %v2028_v62 }
 0xc17   :  { %v2072_v3 = vpop.eup %2071 }
 0xc18   :  { %v542_v4 = vmul.f32 %v2072_v3, %v2269_v26  ;;  %v2032_v3 = vpack.c.bf16 %v36_v1, %v35_v0 }
 0xc1a   :  { %v543_v5 = vadd.f32 %v542_v4, %v2272_v34 }
 0xc1c   :  { %546 = vrot.lane.b32.xlu0 %v543_v5, %s2182_s6  ;;  %v544_v18 = vmul.f32 %v543_v5, %v480_v53 }
 0xc8e   :  { %v547_v7 = vpop.permute.xlu0 %546 }
 0xc8f   :  { %v549_v9 = vmul.f32 %v547_v7, %v543_v5 }
 0xc91   :  { %551 = vrot.lane.b32.xlu1 %v549_v9, %s2183_s7 }
 0xd03   :  { %v552_v10 = vpop.permute.xlu1 %551 }
 0xd04   :  { %v554_v11 = vadd.f32 %v552_v10, %v544_v18  ;;  %v37_v10 = vld [vmem:[#allocation3 + $0x48] sm:$0xff] }
 0xd06   :  { %2073 = vtanh.f32 %v554_v11 }
 0xd10   :  { %v2074_v12 = vpop.eup %2073 }
 0xd11   :  { %557 = vrot.lane.b32.xlu0 %v2074_v12, %s2182_s6 }
 0xd83   :  { %v558_v15 = vpop.permute.xlu0 %557 }
 0xd84   :  { %v2365_v16 = vmul.f32 %v558_v15, %v543_v5 }
 0xd86   :  { %v566_v19 = vpack.c.bf16 %v2365_v16, %v2365_v16 }
 0xd88   :  { %568 = vrot.lane.b32.xlu1 %v566_v19, %s2183_s7  ;;  %v39_v19 = vld [vmem:[#allocation3 + $0x58] sm:$0xff] }
 0xdfa   :  { %v569_v22 = vpop.permute.xlu1 %568 }
 0xdfb   :  { %1905 = vmatmul.mubr.msk.bf16.vlgmr.msra.gmra.mrb[16].mxu1 %vm199_vm5, %v569_v22 }
 0xdfc   :  { %1917 = vmatpush3.bf16.msra.mxu1 %v2221_v6  ;;  %1920 = vmatprep.mubr.msk.bf16.mxu1 %vm2179_vm1, %v2178_v8 }
 0xdfd   :  { %1918 = vmatprep.subr.bf16.mxu1 %v2178_v8 }
 0xe00   :  { %1919 = vmatpush3.bf16.msra.mxu1 %v2236_v13 }
 0xe01   :  { %1944 = vmatprep.subr.bf16.mxu1 %v2178_v8 }
 0xece   :  { %v607_v25 = vpop.f32.mrb[16].mxu1 }
 0xecf   :  { %v613_v27 = vadd.f32 %v607_v25, %v186_v24  ;;  %v1906_v28 = vpop.f32.mrb[17].mxu1 }
 0xed0   :  { %v610_v29 = vpop.f32.mrb[18].mxu1  ;;  %v196_v28 = vadd.f32 %v2264_v21, %v2262_v20 }
 0xed1   :  { %v614_v30 = vmul.f32 %v613_v27, %v2269_v26  ;;  %v1907_v31 = vpop.f32.mrb[19].mxu1 }
 0xed3   :  { %2075 = vtanh.f32 %v614_v30 }
 0xedd   :  { %v2076_v6 = vpop.eup %2075 }
 0xede   :  { %v616_v32 = vmul.f32 %v2076_v6, %v2269_v26 }
 0xee0   :  { %v617_v33 = vadd.f32 %v616_v32, %v2272_v34  ;;  %v2442_v32 = vld [vmem:[#allocation3 + $0x69] ss:$0 sm:$0xff] }
 0xee2   :  { %620 = vrot.lane.b32.xlu0 %v617_v33, %s2182_s6  ;;  %v618_v17 = vmul.f32 %v617_v33, %v554_v11  ;;  %v38_v11 = vld [vmem:[#allocation3 + $0x50] sm:$0xff] }
 0xee3   :  { %v2415_v15 = vpack.c.bf16 %v38_v11, %v37_v10 }
 0xf54   :  { %v621_v13 = vpop.permute.xlu0 %620 }
 0xf55   :  { %v623_v36 = vmul.f32 %v621_v13, %v617_v33 }
 0xf57   :  { %625 = vrot.lane.b32.xlu1 %v623_v36, %s2183_s7 }
 0xfc9   :  { %v626_v37 = vpop.permute.xlu1 %625 }
 0xfca   :  { %v628_v38 = vadd.f32 %v626_v37, %v618_v17 }
 0xfcc   :  { %2077 = vtanh.f32 %v628_v38 }
 0xfd6   :  { %v2078_v39 = vpop.eup %2077 }
 0xfd7   :  { %631 = vrot.lane.b32.xlu0 %v2078_v39, %s2182_s6 }
0x1049   :  { %v632_v40 = vpop.permute.xlu0 %631 }
0x104a   :  { %v2385_v41 = vmul.f32 %v632_v40, %v617_v33 }
0x104c   :  { %v640_v42 = vpack.c.bf16 %v2385_v41, %v2385_v41 }
0x104e   :  { %642 = vrot.lane.b32.xlu1 %v640_v42, %s2183_s7 }
0x10c0   :  { %v643_v43 = vpop.permute.xlu1 %642 }
0x10c1   :  { %1913 = vmatmul.mubr.msk.bf16.vlgmr.msra.gmra.mrb[12].mxu0 %vm199_vm5, %v643_v43 }
0x10c2   :  { %2031 = vmatpush3.bf16.msra.mxu0 %v2028_v62 }
0x10c3   :  { %2033 = vmatprep.subr.bf16.mxu0 %v2032_v3 }
0x10c6   :  { %2035 = vmatpush3.bf16.msra.mxu0 %v2032_v3 }
0x10c7   :  { %1960 = vmatprep.subr.bf16.mxu0 %v2178_v8 }
0x1194   :  { %v681_v46 = vpop.f32.mrb[12].mxu0 }
0x1195   :  { %v687_v47 = vadd.f32 %v681_v46, %v191_v45  ;;  %v1914_v48 = vpop.f32.mrb[13].mxu0 }
0x1196   :  { %v684_v49 = vpop.f32.mrb[14].mxu0 }
0x1197   :  { %v688_v50 = vmul.f32 %v687_v47, %v2269_v26  ;;  %v1915_v51 = vpop.f32.mrb[15].mxu0 }
0x1199   :  { %2079 = vtanh.f32 %v688_v50 }
0x11a3   :  { %v2080_v52 = vpop.eup %2079 }
0x11a4   :  { %v690_v53 = vmul.f32 %v2080_v52, %v2269_v26 }
0x11a6   :  { %v691_v54 = vadd.f32 %v690_v53, %v2272_v34 }
0x11a8   :  { %694 = vrot.lane.b32.xlu0 %v691_v54, %s2182_s6  ;;  %v692_v23 = vmul.f32 %v691_v54, %v628_v38 }
0x121a   :  { %v695_v55 = vpop.permute.xlu0 %694 }
0x121b   :  { %v697_v57 = vmul.f32 %v695_v55, %v691_v54 }
0x121d   :  { %699 = vrot.lane.b32.xlu1 %v697_v57, %s2183_s7 }
0x1221   :  { %266 = vrot.lane.b32.xlu1 %v2279_v44, %s2183_s7 }
0x128f   :  { %v700_v58 = vpop.permute.xlu1 %699 }
0x1290   :  { %v2400_v59 = vadd.f32 %v700_v58, %v692_v23 }
0x1292   :  { %2081 = vtanh.f32 %v2400_v59 }
0x1293   :  { %v267_v63 = vpop.permute.xlu1 %266 }
0x1294   :  { %269 = vst.msk [vmem:[#allocation2] sm:$0xff] %vm199_vm5, %v267_v63 }
0x129b   :  { %v788_v44 = vld [vmem:[#allocation2] sm:$0xff] }
0x129c   :  { %v2082_v4 = vpop.eup %2081  ;;  %1932 = vmatprep.mubr.msk.f32.mxu0 %vm199_vm5, %v788_v44 }
0x129d   :  { %705 = vrot.lane.b32.xlu0 %v2082_v4, %s2182_s6 }
0x12a1   :  { %340 = vrot.lane.b32.xlu0 %v2308_v2, %s2183_s7  ;;  %v40_v2 = vld [vmem:[#allocation3 + $0x60] sm:$0xff] }
0x12a2   :  { %v2420_v22 = vpack.c.bf16 %v40_v2, %v39_v19 }
0x130f   :  { %v706_v5 = vpop.permute.xlu0 %705 }
0x1310   :  { %v2409_v7 = vmul.f32 %v706_v5, %v691_v54 }
0x1312   :  { %v714_v9 = vpack.c.bf16 %v2409_v7, %v2409_v7 }
0x1313   :  { %v341_v18 = vpop.permute.xlu0 %340 }
0x1314   :  { %343 = vst.msk [vmem:[#allocation2 + $0x8] sm:$0xff] %vm199_vm5, %v341_v18  ;;  %716 = vrot.lane.b32.xlu1 %v714_v9, %s2183_s7 }
0x131b   :  { %v789_v12 = vld [vmem:[#allocation2 + $0x8] sm:$0xff] }
0x131c   :  { %1933 = vmatmul.mubr.msk.f32.vlgmr.msra.gmra.mrb[16].mxu0 %vm199_vm5, %v789_v12 }
0x131d   :  { %1961 = vmatpush3.bf16.msra.mxu0 %v2415_v15 }
0x131e   :  { %1962 = vmatprep.subr.bf16.mxu0 %v2178_v8 }
0x1321   :  { %1963 = vmatpush3.bf16.msra.mxu0 %v2420_v22 }
0x1322   :  { %1976 = vmatprep.subr.bf16.mxu0 %v2178_v8 }
0x1386   :  { %v717_v24 = vpop.permute.xlu1 %716 }
0x1387   :  { %1921 = vmatmul.mubr.msk.bf16.vlgmr.msra.gmra.mrb[20].mxu1 %vm199_vm5, %v717_v24 }
0x1388   :  { %1945 = vmatpush3.bf16.msra.mxu1 %v2415_v15  ;;  %1948 = vmatprep.mubr.msk.bf16.mxu1 %vm2179_vm1, %v2178_v8 }
0x1389   :  { %1946 = vmatprep.subr.bf16.mxu1 %v2178_v8 }
0x138c   :  { %1947 = vmatpush3.bf16.msra.mxu1 %v2420_v22 }
0x138d   :  { %1952 = vmatprep.subr.bf16.mxu1 %v2178_v8 }
0x138f   :  { %1949 = vmatmul.mubr.bf16.vlgmr.msra.gmra.mrb[24].mxu1 %v2180_v14 }
0x1390   :  { %1953 = vmatpush3.bf16.msra.mxu1 %v2415_v15  ;;  %1956 = vmatprep.mubr.msk.bf16.mxu1 %vm2179_vm1, %v2178_v8 }
0x1391   :  { %1954 = vmatprep.subr.bf16.mxu1 %v2178_v8 }
0x1394   :  { %1955 = vmatpush3.bf16.msra.mxu1 %v2420_v22 }
0x1395   :  { %1968 = vmatprep.subr.bf16.mxu1 %v2178_v8 }
0x13ef   :  { %v2438_v25 = vpop.f32.mrb[16].mxu0 }
0x13f0   :  { %v890_v27 = vpop.f32.mrb[17].mxu0 }
0x13f1   :  { %v891_v33 = vadd.f32 %v2442_v32, %v890_v27 }
0x145a   :  { %v755_v29 = vpop.f32.mrb[20].mxu1 }
0x145b   :  { %v761_v30 = vadd.f32 %v755_v29, %v196_v28  ;;  %v1922_v14 = vpop.f32.mrb[21].mxu1 }
0x145c   :  { %v758_v31 = vpop.f32.mrb[22].mxu1 }
0x145d   :  { %v1923_v6 = vpop.f32.mrb[23].mxu1  ;;  %v762_v45 = vmul.f32 %v761_v30, %v2269_v26 }
0x1462   :  { %v963_v13 = vpop.f32.mrb[24].mxu1 }
0x1463   :  { %v969_v36 = vadd.f32 %v963_v13, %v891_v33  ;;  %v1950_v17 = vpop.f32.mrb[25].mxu1 }
0x1464   :  { %v966_v37 = vpop.f32.mrb[26].mxu1 }
0x1465   :  { %v970_v38 = vmul.f32 %v969_v36, %v2269_v26  ;;  %v1951_v39 = vpop.f32.mrb[27].mxu1 }
0x1467   :  { %2083 = vtanh.f32 %v970_v38 }
0x1468   :  { %2085 = vtanh.f32 %v762_v45 }
0x1471   :  { %v2084_v40 = vpop.eup %2083 }
0x1472   :  { %v972_v20 = vmul.f32 %v2084_v40, %v2269_v26  ;;  %v2086_v49 = vpop.eup %2085 }
0x1473   :  { %v764_v50 = vmul.f32 %v2086_v49, %v2269_v26 }
0x1474   :  { %v973_v21 = vadd.f32 %v972_v20, %v2272_v34 }
0x1475   :  { %v765_v52 = vadd.f32 %v764_v50, %v2272_v34 }
0x1476   :  { %976 = vrot.lane.b32.xlu0 %v973_v21, %s2182_s6  ;;  %v974_v46 = vmul.f32 0.0, %v973_v21 }
0x1477   :  { %v766_v60 = vmul.f32 %v765_v52, %v2400_v59 }
0x14e8   :  { %v977_v42 = vpop.permute.xlu0 %976 }
0x14e9   :  { %v979_v43 = vmul.f32 %v977_v42, %v973_v21 }
0x14eb   :  { %981 = vrot.lane.b32.xlu1 %v979_v43, %s2183_s7 }
0x155d   :  { %v982_v47 = vpop.permute.xlu1 %981 }
0x155e   :  { %v984_v48 = vadd.f32 %v982_v47, %v974_v46 }
0x1560   :  { %2087 = vtanh.f32 %v984_v48 }
0x156a   :  { %v2088_v51 = vpop.eup %2087 }
0x156b   :  { %987 = vrot.lane.b32.xlu0 %v2088_v51, %s2182_s6 }
0x156f   :  { %768 = vrot.lane.b32.xlu0 %v765_v52, %s2182_s6 }
0x15dd   :  { %v988_v53 = vpop.permute.xlu0 %987 }
0x15de   :  { %v2455_v54 = vmul.f32 %v988_v53, %v973_v21 }
0x15e0   :  { %v996_v55 = vpack.c.bf16 %v2455_v54, %v2455_v54 }
0x15e1   :  { %v769_v57 = vpop.permute.xlu0 %768 }
0x15e2   :  { %v771_v23 = vmul.f32 %v769_v57, %v765_v52  ;;  %998 = vrot.lane.b32.xlu1 %v996_v55, %s2183_s7 }
0x15e4   :  { %773 = vrot.lane.b32.xlu0 %v771_v23, %s2183_s7 }
0x1654   :  { %v999_v58 = vpop.permute.xlu1 %998 }
0x1655   :  { %1957 = vmatmul.mubr.msk.bf16.vlgmr.msra.gmra.mrb[28].mxu1 %vm199_vm5, %v999_v58 }
0x1656   :  { %v774_v61 = vpop.permute.xlu0 %773  ;;  %1969 = vmatpush3.bf16.msra.mxu1 %v2415_v15  ;;  %1972 = vmatprep.mubr.msk.bf16.mxu1 %vm2179_vm1, %v2178_v8 }
0x1657   :  { %v776_v62 = vadd.f32 %v774_v61, %v766_v60  ;;  %1970 = vmatprep.subr.bf16.mxu1 %v2178_v8 }
0x1659   :  { %2089 = vtanh.f32 %v776_v62 }
0x165a   :  { %1971 = vmatpush3.bf16.msra.mxu1 %v2420_v22 }
0x165b   :  { %1984 = vmatprep.subr.bf16.mxu1 %v2178_v8 }
0x1663   :  { %v2090_v63 = vpop.eup %2089 }
0x1664   :  { %779 = vrot.lane.b32.xlu0 %v2090_v63, %s2182_s6 }
0x1668   :  { %414 = vrot.lane.b32.xlu0 %v2327_v35, %s2183_s7  ;;  %v896_v35 = vadd.f32 %v2438_v25, %v2442_v32 }
0x166c   :  { %562 = vrot.lane.b32.xlu0 %v2365_v16, %s2183_s7 }
0x1670   :  { %710 = vrot.lane.b32.xlu0 %v2409_v7, %s2183_s7 }
0x16d6   :  { %v780_v59 = vpop.permute.xlu0 %779 }
0x16d7   :  { %v782_v29 = vmul.f32 %v780_v59, %v765_v52 }
0x16da   :  { %v415_v0 = vpop.permute.xlu0 %414 }
0x16db   :  { %417 = vst.msk [vmem:[#allocation2 + $0x10] sm:$0xff] %vm199_vm5, %v415_v0 }
0x16de   :  { %v563_v1 = vpop.permute.xlu0 %562 }
0x16df   :  { %565 = vst.msk [vmem:[#allocation2 + $0x20] sm:$0xff] %vm199_vm5, %v563_v1 }
0x16e2   :  { %v711_v3 = vpop.permute.xlu0 %710  ;;  %v790_v44 = vld [vmem:[#allocation2 + $0x10] sm:$0xff] }
0x16e3   :  { %713 = vst.msk [vmem:[#allocation2 + $0x30] sm:$0xff] %vm199_vm5, %v711_v3  ;;  %1935 = vmatprep.mubr.msk.f32.mxu0 %vm199_vm5, %v790_v44 }
0x16ea   :  { %v794_v17 = vld [vmem:[#allocation2 + $0x30] sm:$0xff] }
0x1728   :  { %v1037_v16 = vpop.f32.mrb[28].mxu1 }
0x1729   :  { %v1043_v4 = vadd.f32 %v1037_v16, %v896_v35  ;;  %v1958_v5 = vpop.f32.mrb[29].mxu1 }
0x172a   :  { %v1040_v7 = vpop.f32.mrb[30].mxu1 }
0x172b   :  { %v1044_v9 = vmul.f32 %v1043_v4, %v2269_v26  ;;  %v1959_v18 = vpop.f32.mrb[31].mxu1 }
0x172d   :  { %2091 = vtanh.f32 %v1044_v9 }
0x1737   :  { %v2092_v10 = vpop.eup %2091 }
0x1738   :  { %v1046_v11 = vmul.f32 %v2092_v10, %v2269_v26 }
0x173a   :  { %v1047_v12 = vadd.f32 %v1046_v11, %v2272_v34 }
0x173c   :  { %1050 = vrot.lane.b32.xlu1 %v1047_v12, %s2182_s6  ;;  %v1048_v24 = vmul.f32 %v1047_v12, %v984_v48 }
0x17ae   :  { %v1051_v19 = vpop.permute.xlu1 %1050 }
0x17af   :  { %v1053_v2 = vmul.f32 %v1051_v19, %v1047_v12 }
0x17b1   :  { %1055 = vrot.lane.b32.xlu1 %v1053_v2, %s2183_s7 }
0x1823   :  { %v1056_v25 = vpop.permute.xlu1 %1055 }
0x1824   :  { %v1058_v27 = vadd.f32 %v1056_v25, %v1048_v24 }
0x1826   :  { %2093 = vtanh.f32 %v1058_v27 }
0x1830   :  { %v2094_v28 = vpop.eup %2093 }
0x1831   :  { %1061 = vrot.lane.b32.xlu1 %v2094_v28, %s2182_s6 }
0x1835   :  { %488 = vrot.lane.b32.xlu1 %v2346_v56, %s2183_s7 }
0x1839   :  { %636 = vrot.lane.b32.xlu1 %v2385_v41, %s2183_s7  ;;  %v792_v41 = vld [vmem:[#allocation2 + $0x20] sm:$0xff] }
0x183d   :  { %784 = vrot.lane.b32.xlu1 %v782_v29, %s2183_s7 }
0x18a3   :  { %v1062_v30 = vpop.permute.xlu1 %1061 }
0x18a4   :  { %v2493_v14 = vmul.f32 %v1062_v30, %v1047_v12 }
0x18a6   :  { %v1070_v31 = vpack.c.bf16 %v2493_v14, %v2493_v14 }
0x18a7   :  { %v489_v6 = vpop.permute.xlu1 %488 }
0x18a8   :  { %491 = vst.msk [vmem:[#allocation2 + $0x18] sm:$0xff] %vm199_vm5, %v489_v6  ;;  %1072 = vrot.lane.b32.xlu0 %v1070_v31, %s2183_s7 }
0x18ab   :  { %v637_v33 = vpop.permute.xlu1 %636 }
0x18ac   :  { %639 = vst.msk [vmem:[#allocation2 + $0x28] sm:$0xff] %vm199_vm5, %v637_v33 }
0x18af   :  { %v785_v56 = vpop.permute.xlu1 %784  ;;  %v791_v13 = vld [vmem:[#allocation2 + $0x18] sm:$0xff] }
0x18b0   :  { %787 = vst.msk [vmem:[#allocation2 + $0x38] sm:$0xff] %vm199_vm5, %v785_v56  ;;  %1936 = vmatmul.mubr.msk.f32.gmra.mrb[18].mxu0 %vm199_vm5, %v791_v13 }
0x18b1   :  { %1938 = vmatprep.mubr.msk.f32.mxu0 %vm199_vm5, %v792_v41 }
0x18b3   :  { %v793_v36 = vld [vmem:[#allocation2 + $0x28] sm:$0xff] }
0x18b4   :  { %1939 = vmatmul.mubr.msk.f32.gmra.mrb[20].mxu0 %vm199_vm5, %v793_v36 }
0x18b5   :  { %1941 = vmatprep.mubr.msk.f32.mxu0 %vm199_vm5, %v794_v17 }
0x18b7   :  { %v795_v37 = vld [vmem:[#allocation2 + $0x38] sm:$0xff] }
0x18b8   :  { %1942 = vmatmul.mubr.msk.f32.gmra.mrb[22].mxu0 %vm199_vm5, %v795_v37 }
0x18b9   :  { %1964 = vmatprep.mubr.msk.bf16.mxu0 %vm2179_vm1, %v2178_v8 }
0x191a   :  { %v1073_v38 = vpop.permute.xlu0 %1072 }
0x191b   :  { %1965 = vmatmul.mubr.msk.bf16.vlgmr.msra.gmra.mrb[24].mxu0 %vm199_vm5, %v1073_v38 }
0x191c   :  { %1977 = vmatpush3.bf16.msra.mxu0 %v2415_v15  ;;  %1980 = vmatprep.mubr.msk.bf16.mxu0 %vm2179_vm1, %v2178_v8 }
0x191d   :  { %1978 = vmatprep.subr.bf16.mxu0 %v2178_v8 }
0x1920   :  { %1979 = vmatpush3.bf16.msra.mxu0 %v2420_v22 }
0x1921   :  { %1992 = vmatprep.subr.bf16.mxu0 %v2178_v8 }
0x1983   :  { %v1937_v39 = vpop.f32.mrb[18].mxu0 }
0x1984   :  { %v900_v40 = vpop.f32.mrb[19].mxu0  ;;  %v906_v3 = vadd.f32 %v1937_v39, %v2442_v32 }
0x1985   :  { %v901_v45 = vadd.f32 %v2442_v32, %v900_v40 }
0x1987   :  { %v2515_v20 = vpop.f32.mrb[20].mxu0 }
0x1988   :  { %v2517_v21 = vpop.f32.mrb[21].mxu0 }
0x1989   :  { %v911_v31 = vadd.f32 %v2442_v32, %v2517_v21 }
0x198b   :  { %v2519_v42 = vpop.f32.mrb[22].mxu0 }
0x198c   :  { %v2521_v43 = vpop.f32.mrb[23].mxu0 }
0x19ee   :  { %v1111_v46 = vpop.f32.mrb[24].mxu0 }
0x19ef   :  { %v1117_v47 = vadd.f32 %v1111_v46, %v901_v45  ;;  %v1966_v48 = vpop.f32.mrb[25].mxu0 }
0x19f0   :  { %v1114_v49 = vpop.f32.mrb[26].mxu0 }
0x19f1   :  { %v1118_v50 = vmul.f32 %v1117_v47, %v2269_v26  ;;  %v1967_v51 = vpop.f32.mrb[27].mxu0 }
0x19f3   :  { %2095 = vtanh.f32 %v1118_v50 }
0x19fd   :  { %v2096_v52 = vpop.eup %2095 }
0x19fe   :  { %v1120_v53 = vmul.f32 %v2096_v52, %v2269_v26  ;;  %v916_v52 = vadd.f32 %v2515_v20, %v2442_v32 }
0x1a00   :  { %v1121_v55 = vadd.f32 %v1120_v53, %v2272_v34 }
0x1a02   :  { %1124 = vrot.lane.b32.xlu1 %v1121_v55, %s2182_s6  ;;  %v1122_v58 = vmul.f32 %v1121_v55, %v1058_v27 }
0x1a74   :  { %v1125_v57 = vpop.permute.xlu1 %1124 }
0x1a75   :  { %v1127_v23 = vmul.f32 %v1125_v57, %v1121_v55 }
0x1a77   :  { %1129 = vrot.lane.b32.xlu0 %v1127_v23, %s2183_s7 }
0x1ae9   :  { %v1130_v60 = vpop.permute.xlu0 %1129 }
0x1aea   :  { %v1132_v61 = vadd.f32 %v1130_v60, %v1122_v58 }
0x1aec   :  { %2097 = vtanh.f32 %v1132_v61 }
0x1af6   :  { %v2098_v62 = vpop.eup %2097 }
0x1af7   :  { %1135 = vrot.lane.b32.xlu1 %v2098_v62, %s2182_s6 }
0x1b69   :  { %v1136_v63 = vpop.permute.xlu1 %1135 }
0x1b6a   :  { %v2530_v59 = vmul.f32 %v1136_v63, %v1121_v55 }
0x1b6c   :  { %v1144_v0 = vpack.c.bf16 %v2530_v59, %v2530_v59 }
0x1b6e   :  { %1146 = vrot.lane.b32.xlu0 %v1144_v0, %s2183_s7 }
0x1be0   :  { %v1147_v1 = vpop.permute.xlu0 %1146 }
0x1be1   :  { %1973 = vmatmul.mubr.msk.bf16.vlgmr.msra.gmra.mrb[32].mxu1 %vm199_vm5, %v1147_v1 }
0x1be2   :  { %1985 = vmatpush3.bf16.msra.mxu1 %v2415_v15  ;;  %1988 = vmatprep.mubr.msk.bf16.mxu1 %vm2179_vm1, %v2178_v8 }
0x1be3   :  { %1986 = vmatprep.subr.bf16.mxu1 %v2178_v8 }
0x1be6   :  { %1987 = vmatpush3.bf16.msra.mxu1 %v2420_v22 }
0x1be7   :  { %2000 = vmatprep.subr.bf16.mxu1 %v2178_v8 }
0x1cb4   :  { %v1185_v44 = vpop.f32.mrb[32].mxu1 }
0x1cb5   :  { %v1191_v35 = vadd.f32 %v1185_v44, %v906_v3  ;;  %v1974_v16 = vpop.f32.mrb[33].mxu1 }
0x1cb6   :  { %v1188_v4 = vpop.f32.mrb[34].mxu1 }
0x1cb7   :  { %v1192_v5 = vmul.f32 %v1191_v35, %v2269_v26  ;;  %v1975_v7 = vpop.f32.mrb[35].mxu1  ;;  %v921_v4 = vadd.f32 %v2442_v32, %v2521_v43 }
0x1cb9   :  { %2099 = vtanh.f32 %v1192_v5 }
0x1cc3   :  { %v2100_v9 = vpop.eup %2099 }
0x1cc4   :  { %v1194_v18 = vmul.f32 %v2100_v9, %v2269_v26 }
0x1cc6   :  { %v1195_v10 = vadd.f32 %v1194_v18, %v2272_v34 }
0x1cc8   :  { %1198 = vrot.lane.b32.xlu1 %v1195_v10, %s2182_s6  ;;  %v1196_v19 = vmul.f32 %v1195_v10, %v1132_v61 }
0x1d3a   :  { %v1199_v11 = vpop.permute.xlu1 %1198 }
0x1d3b   :  { %v1201_v12 = vmul.f32 %v1199_v11, %v1195_v10 }
0x1d3d   :  { %1203 = vrot.lane.b32.xlu0 %v1201_v12, %s2183_s7 }
0x1daf   :  { %v1204_v2 = vpop.permute.xlu0 %1203 }
0x1db0   :  { %v1206_v24 = vadd.f32 %v1204_v2, %v1196_v19 }
0x1db2   :  { %2101 = vtanh.f32 %v1206_v24 }
0x1dbc   :  { %v2102_v25 = vpop.eup %2101 }
0x1dbd   :  { %1209 = vrot.lane.b32.xlu1 %v2102_v25, %s2182_s6 }
0x1e2f   :  { %v1210_v27 = vpop.permute.xlu1 %1209 }
0x1e30   :  { %v2549_v28 = vmul.f32 %v1210_v27, %v1195_v10 }
0x1e32   :  { %v1218_v29 = vpack.c.bf16 %v2549_v28, %v2549_v28 }
0x1e34   :  { %1220 = vrot.lane.b32.xlu0 %v1218_v29, %s2183_s7 }
0x1ea6   :  { %v1221_v30 = vpop.permute.xlu0 %1220 }
0x1ea7   :  { %1981 = vmatmul.mubr.msk.bf16.vlgmr.msra.gmra.mrb[28].mxu0 %vm199_vm5, %v1221_v30 }
0x1ea8   :  { %1993 = vmatpush3.bf16.msra.mxu0 %v2415_v15  ;;  %1996 = vmatprep.mubr.msk.bf16.mxu0 %vm2179_vm1, %v2178_v8 }
0x1ea9   :  { %1994 = vmatprep.subr.bf16.mxu0 %v2178_v8 }
0x1eac   :  { %1995 = vmatpush3.bf16.msra.mxu0 %v2420_v22 }
0x1f7a   :  { %v1259_v6 = vpop.f32.mrb[28].mxu0 }
0x1f7b   :  { %v1265_v33 = vadd.f32 %v1259_v6, %v911_v31  ;;  %v1982_v56 = vpop.f32.mrb[29].mxu0 }
0x1f7c   :  { %v1262_v13 = vpop.f32.mrb[30].mxu0 }
0x1f7d   :  { %v1266_v41 = vmul.f32 %v1265_v33, %v2269_v26  ;;  %v1983_v36 = vpop.f32.mrb[31].mxu0  ;;  %v926_v13 = vadd.f32 %v2519_v42, %v2442_v32 }
0x1f7f   :  { %2103 = vtanh.f32 %v1266_v41 }
0x1f89   :  { %v2104_v17 = vpop.eup %2103 }
0x1f8a   :  { %v1268_v37 = vmul.f32 %v2104_v17, %v2269_v26 }
0x1f8c   :  { %v1269_v38 = vadd.f32 %v1268_v37, %v2272_v34 }
0x1f8e   :  { %1272 = vrot.lane.b32.xlu1 %v1269_v38, %s2182_s6  ;;  %v1270_v21 = vmul.f32 %v1269_v38, %v1206_v24 }
0x2000   :  { %v1273_v39 = vpop.permute.xlu1 %1272 }
0x2001   :  { %v1275_v40 = vmul.f32 %v1273_v39, %v1269_v38 }
0x2003   :  { %1277 = vrot.lane.b32.xlu0 %v1275_v40, %s2183_s7 }
0x2075   :  { %v1278_v45 = vpop.permute.xlu0 %1277 }
0x2076   :  { %v1280_v46 = vadd.f32 %v1278_v45, %v1270_v21 }
0x2078   :  { %2105 = vtanh.f32 %v1280_v46 }
0x2082   :  { %v2106_v47 = vpop.eup %2105 }
0x2083   :  { %1283 = vrot.lane.b32.xlu1 %v2106_v47, %s2182_s6 }
0x20f5   :  { %v1284_v48 = vpop.permute.xlu1 %1283 }
0x20f6   :  { %v2568_v49 = vmul.f32 %v1284_v48, %v1269_v38  ;;  %v45_v48 = vld [vmem:[#allocation3 + $0x70] sm:$0xff] }
0x20f8   :  { %v1292_v50 = vpack.c.bf16 %v2568_v49, %v2568_v49 }
0x20fa   :  { %1294 = vrot.lane.b32.xlu0 %v1292_v50, %s2183_s7  ;;  %v46_v50 = vld [vmem:[#allocation3 + $0x78] sm:$0xff] }
0x216c   :  { %v1295_v51 = vpop.permute.xlu0 %1294 }
0x216d   :  { %1989 = vmatmul.mubr.msk.bf16.vlgmr.msra.gmra.mrb[36].mxu1 %vm199_vm5, %v1295_v51  ;;  %v2036_v51 = vpack.c.bf16 %v46_v50, %v45_v48 }
0x216e   :  { %2001 = vmatpush3.bf16.msra.mxu1 %v2415_v15  ;;  %2004 = vmatprep.mubr.msk.bf16.mxu1 %vm2179_vm1, %v2178_v8 }
0x216f   :  { %2002 = vmatprep.subr.bf16.mxu1 %v2178_v8  ;;  %2037 = vmatprep.subr.bf16.mxu0 %v2036_v51 }
0x2172   :  { %2003 = vmatpush3.bf16.msra.mxu1 %v2420_v22 }
0x2240   :  { %v1333_v53 = vpop.f32.mrb[36].mxu1 }
0x2241   :  { %v1339_v55 = vadd.f32 %v1333_v53, %v916_v52  ;;  %v1990_v57 = vpop.f32.mrb[37].mxu1  ;;  %v47_v52 = vld [vmem:[#allocation3 + $0x80] sm:$0xff] }
0x2242   :  { %v1336_v23 = vpop.f32.mrb[38].mxu1 }
0x2243   :  { %v1340_v58 = vmul.f32 %v1339_v55, %v2269_v26  ;;  %v1991_v60 = vpop.f32.mrb[39].mxu1 }
0x2245   :  { %2107 = vtanh.f32 %v1340_v58 }
0x224f   :  { %v2108_v61 = vpop.eup %2107 }
0x2250   :  { %v1342_v15 = vmul.f32 %v2108_v61, %v2269_v26 }
0x2252   :  { %v1343_v62 = vadd.f32 %v1342_v15, %v2272_v34 }
0x2254   :  { %1346 = vrot.lane.b32.xlu1 %v1343_v62, %s2182_s6  ;;  %v1344_v20 = vmul.f32 %v1343_v62, %v1280_v46 }
0x22c6   :  { %v1347_v8 = vpop.permute.xlu1 %1346 }
0x22c7   :  { %v1349_v22 = vmul.f32 %v1347_v8, %v1343_v62 }
0x22c9   :  { %1351 = vrot.lane.b32.xlu0 %v1349_v22, %s2183_s7 }
0x233b   :  { %v1352_v63 = vpop.permute.xlu0 %1351 }
0x233c   :  { %v1354_v0 = vadd.f32 %v1352_v63, %v1344_v20 }
0x233e   :  { %2109 = vtanh.f32 %v1354_v0 }
0x2348   :  { %v2110_v1 = vpop.eup %2109 }
0x2349   :  { %1357 = vrot.lane.b32.xlu1 %v2110_v1, %s2182_s6 }
0x23bb   :  { %v1358_v3 = vpop.permute.xlu1 %1357 }
0x23bc   :  { %v2587_v44 = vmul.f32 %v1358_v3, %v1343_v62 }
0x23be   :  { %v1366_v35 = vpack.c.bf16 %v2587_v44, %v2587_v44 }
0x23c0   :  { %1368 = vrot.lane.b32.xlu0 %v1366_v35, %s2183_s7 }
0x2432   :  { %v1369_v16 = vpop.permute.xlu0 %1368 }
0x2433   :  { %1997 = vmatmul.mubr.msk.bf16.vlgmr.msra.gmra.mrb[32].mxu0 %vm199_vm5, %v1369_v16 }
0x2434   :  { %2039 = vmatpush3.bf16.msra.mxu0 %v2036_v51 }
0x2506   :  { %v1407_v5 = vpop.f32.mrb[32].mxu0 }
0x2507   :  { %v1413_v7 = vadd.f32 %v1407_v5, %v921_v4  ;;  %v1998_v9 = vpop.f32.mrb[33].mxu0 }
0x2508   :  { %v1410_v18 = vpop.f32.mrb[34].mxu0 }
0x2509   :  { %v1414_v10 = vmul.f32 %v1413_v7, %v2269_v26  ;;  %v1999_v11 = vpop.f32.mrb[35].mxu0  ;;  %v1756_v18 = vld [vmem:[#allocation3 + $0x90] ss:$0 sm:$0xff] }
0x250b   :  { %2111 = vtanh.f32 %v1414_v10 }
0x2515   :  { %v2112_v12 = vpop.eup %2111 }
0x2516   :  { %v1416_v19 = vmul.f32 %v2112_v12, %v2269_v26 }
0x2518   :  { %v1417_v2 = vadd.f32 %v1416_v19, %v2272_v34 }
0x251a   :  { %1420 = vrot.lane.b32.xlu1 %v1417_v2, %s2182_s6  ;;  %v1418_v43 = vmul.f32 %v1417_v2, %v1354_v0 }
0x258c   :  { %v1421_v24 = vpop.permute.xlu1 %1420 }
0x258d   :  { %v1423_v25 = vmul.f32 %v1421_v24, %v1417_v2 }
0x258f   :  { %1425 = vrot.lane.b32.xlu0 %v1423_v25, %s2183_s7 }
0x2601   :  { %v1426_v27 = vpop.permute.xlu0 %1425 }
0x2602   :  { %v1428_v29 = vadd.f32 %v1426_v27, %v1418_v43 }
0x2604   :  { %2113 = vtanh.f32 %v1428_v29 }
0x260e   :  { %v2114_v30 = vpop.eup %2113 }
0x260f   :  { %1431 = vrot.lane.b32.xlu1 %v2114_v30, %s2182_s6 }
0x2681   :  { %v1432_v31 = vpop.permute.xlu1 %1431 }
0x2682   :  { %v1434_v6 = vmul.f32 %v1432_v31, %v1417_v2 }
0x2684   :  { %v1440_v33 = vpack.c.bf16 %v1434_v6, %v1434_v6 }
0x2686   :  { %1442 = vrot.lane.b32.xlu0 %v1440_v33, %s2183_s7 }
0x26f8   :  { %v1443_v56 = vpop.permute.xlu0 %1442 }
0x26f9   :  { %2005 = vmatmul.mubr.msk.bf16.vlgmr.msra.gmra.mrb[40].mxu1 %vm199_vm5, %v1443_v56 }
0x27cc   :  { %v1481_v41 = vpop.f32.mrb[40].mxu1 }
0x27cd   :  { %v1487_v36 = vadd.f32 %v1481_v41, %v926_v13  ;;  %v2006_v17 = vpop.f32.mrb[41].mxu1 }
0x27ce   :  { %v1484_v37 = vpop.f32.mrb[42].mxu1 }
0x27cf   :  { %v1488_v38 = vmul.f32 %v1487_v36, %v2269_v26  ;;  %v2007_v39 = vpop.f32.mrb[43].mxu1 }
0x27d1   :  { %2115 = vtanh.f32 %v1488_v38 }
0x27db   :  { %v2116_v40 = vpop.eup %2115 }
0x27dc   :  { %v1490_v21 = vmul.f32 %v2116_v40, %v2269_v26 }
0x27de   :  { %v1491_v45 = vadd.f32 %v1490_v21, %v2272_v34 }
0x27e0   :  { %1494 = vrot.lane.b32.xlu1 %v1491_v45, %s2182_s6  ;;  %v1492_v26 = vmul.f32 %v1491_v45, %v1428_v29 }
0x2852   :  { %v1495_v46 = vpop.permute.xlu1 %1494 }
0x2853   :  { %v1497_v47 = vmul.f32 %v1495_v46, %v1491_v45 }
0x2855   :  { %1499 = vrot.lane.b32.xlu0 %v1497_v47, %s2183_s7 }
0x2859   :  { %992 = vrot.lane.b32.xlu0 %v2455_v54, %s2183_s7 }
0x285d   :  { %1140 = vrot.lane.b32.xlu0 %v2530_v59, %s2183_s7  ;;  %v48_v59 = vld [vmem:[#allocation3 + $0x88] sm:$0xff] }
0x2861   :  { %1288 = vrot.lane.b32.xlu0 %v2568_v49, %s2183_s7  ;;  %v2040_v49 = vpack.c.bf16 %v48_v59, %v47_v52 }
0x2863   :  { %2041 = vmatprep.subr.bf16.mxu0 %v2040_v49 }
0x2864   :  { %2043 = vmatpush3.bf16.msra.mxu0 %v2040_v49 }
0x2865   :  { %1436 = vrot.lane.b32.xlu0 %v1434_v6, %s2183_s7 }
0x28c7   :  { %v1500_v32 = vpop.permute.xlu0 %1499 }
0x28c8   :  { %v1502_v34 = vadd.f32 %v1500_v32, %v1492_v26 }
0x28ca   :  { %2117 = vtanh.f32 %v1502_v34 }
0x28cb   :  { %v993_v42 = vpop.permute.xlu0 %992 }
0x28cc   :  { %995 = vst.msk [vmem:[#allocation2] sm:$0xff] %vm199_vm5, %v993_v42 }
0x28cf   :  { %v1141_v54 = vpop.permute.xlu0 %1140 }
0x28d0   :  { %1143 = vst.msk [vmem:[#allocation2 + $0x10] sm:$0xff] %vm199_vm5, %v1141_v54 }
0x28d3   :  { %v1289_v53 = vpop.permute.xlu0 %1288  ;;  %v1514_v55 = vld [vmem:[#allocation2] sm:$0xff] }
0x28d4   :  { %v2118_v57 = vpop.eup %2117  ;;  %1291 = vst.msk [vmem:[#allocation2 + $0x20] sm:$0xff] %vm199_vm5, %v1289_v53  ;;  %v1522_v23 = vmax.f32 %v1514_v55, 0.0 }
0x28d5   :  { %1505 = vrot.lane.b32.xlu1 %v2118_v57, %s2182_s6 }
0x28d6   :  { %2016 = vmatprep.mubr.msk.f32.mxu0 %vm199_vm5, %v1522_v23 }
0x28d7   :  { %v1437_v58 = vpop.permute.xlu0 %1436  ;;  %v1516_v8 = vld [vmem:[#allocation2 + $0x10] sm:$0xff] }
0x28d8   :  { %1439 = vst.msk [vmem:[#allocation2 + $0x30] sm:$0xff] %vm199_vm5, %v1437_v58 }
0x28d9   :  { %1066 = vrot.lane.b32.xlu1 %v2493_v14, %s2183_s7 }
0x28db   :  { %v1518_v63 = vld [vmem:[#allocation2 + $0x20] sm:$0xff] }
0x28dc   :  { %v1526_v3 = vmax.f32 %v1518_v63, 0.0 }
0x28dd   :  { %1214 = vrot.lane.b32.xlu1 %v2549_v28, %s2183_s7  ;;  %v1524_v28 = vmax.f32 %v1516_v8, 0.0 }
0x28e1   :  { %1362 = vrot.lane.b32.xlu1 %v2587_v44, %s2183_s7  ;;  %v1520_v44 = vld [vmem:[#allocation2 + $0x30] sm:$0xff] }
0x28e2   :  { %v1528_v4 = vmax.f32 %v1520_v44, 0.0 }
0x2947   :  { %v1506_v60 = vpop.permute.xlu1 %1505 }
0x2948   :  { %v1508_v61 = vmul.f32 %v1506_v60, %v1491_v45 }
0x294a   :  { %1510 = vrot.lane.b32.xlu1 %v1508_v61, %s2183_s7 }
0x294b   :  { %v1067_v15 = vpop.permute.xlu1 %1066 }
0x294c   :  { %1069 = vst.msk [vmem:[#allocation2 + $0x8] sm:$0xff] %vm199_vm5, %v1067_v15 }
0x294f   :  { %v1215_v62 = vpop.permute.xlu1 %1214 }
0x2950   :  { %1217 = vst.msk [vmem:[#allocation2 + $0x18] sm:$0xff] %vm199_vm5, %v1215_v62 }
0x2953   :  { %v1363_v22 = vpop.permute.xlu1 %1362  ;;  %v1515_v20 = vld [vmem:[#allocation2 + $0x8] sm:$0xff] }
0x2954   :  { %1365 = vst.msk [vmem:[#allocation2 + $0x28] sm:$0xff] %vm199_vm5, %v1363_v22  ;;  %v1523_v14 = vmax.f32 %v1515_v20, 0.0 }
0x2956   :  { %2017 = vmatmul.mubr.msk.f32.vlgmr.msra.gmra.mrb[36].mxu0 %vm199_vm5, %v1523_v14 }
0x2957   :  { %2019 = vmatprep.mubr.msk.f32.mxu0 %vm199_vm5, %v1524_v28  ;;  %v1517_v0 = vld [vmem:[#allocation2 + $0x18] sm:$0xff] }
0x2958   :  { %v1525_v1 = vmax.f32 %v1517_v0, 0.0 }
0x295a   :  { %2020 = vmatmul.mubr.msk.f32.gmra.mrb[38].mxu0 %vm199_vm5, %v1525_v1 }
0x295b   :  { %2022 = vmatprep.mubr.msk.f32.mxu0 %vm199_vm5, %v1526_v3  ;;  %v1519_v35 = vld [vmem:[#allocation2 + $0x28] sm:$0xff] }
0x295c   :  { %v1527_v16 = vmax.f32 %v1519_v35, 0.0 }
0x295e   :  { %2023 = vmatmul.mubr.msk.f32.gmra.mrb[40].mxu0 %vm199_vm5, %v1527_v16 }
0x295f   :  { %2025 = vmatprep.mubr.msk.f32.mxu0 %vm199_vm5, %v1528_v4 }
0x29bc   :  { %v1511_v5 = vpop.permute.xlu1 %1510 }
0x29bd   :  { %1513 = vst.msk [vmem:[#allocation2 + $0x38] sm:$0xff] %vm199_vm5, %v1511_v5 }
0x29c4   :  { %v1521_v7 = vld [vmem:[#allocation2 + $0x38] sm:$0xff] }
0x29c5   :  { %v1529_v9 = vmax.f32 %v1521_v7, 0.0 }
0x29c7   :  { %2026 = vmatmul.mubr.msk.f32.gmra.mrb[42].mxu0 %vm199_vm5, %v1529_v9 }
0x2a29   :  { %v2018_v10 = vpop.f32.mrb[36].mxu0 }
0x2a2a   :  { %v1630_v11 = vadd.f32 %v2018_v10, %v1756_v18  ;;  %v1624_v12 = vpop.f32.mrb[37].mxu0 }
0x2a2b   :  { %v1625_v19 = vadd.f32 %v1756_v18, %v1624_v12 }
0x2a2c   :  { %v1665_v2 = vmul.f32 1.442695, %v1630_v11 }
0x2a2d   :  { %v1663_v24 = vmul.f32 1.442695, %v1625_v19  ;;  %v2021_v25 = vpop.f32.mrb[38].mxu0 }
0x2a2e   :  { %2119 = vpow2.f32 %v1665_v2  ;;  %v1640_v43 = vadd.f32 %v2021_v25, %v1756_v18  ;;  %v1634_v27 = vpop.f32.mrb[39].mxu0 }
0x2a2f   :  { %2121 = vpow2.f32 %v1663_v24  ;;  %v1635_v29 = vadd.f32 %v1756_v18, %v1634_v27 }
0x2a30   :  { %v1669_v6 = vmul.f32 1.442695, %v1640_v43 }
0x2a31   :  { %v1667_v30 = vmul.f32 1.442695, %v1635_v29  ;;  %v2024_v31 = vpop.f32.mrb[40].mxu0 }
0x2a32   :  { %v1644_v33 = vpop.f32.mrb[41].mxu0  ;;  %v1650_v56 = vadd.f32 %v2024_v31, %v1756_v18 }
0x2a33   :  { %2123 = vpow2.f32 %v1667_v30  ;;  %v1645_v13 = vadd.f32 %v1756_v18, %v1644_v33 }
0x2a34   :  { %2125 = vpow2.f32 %v1669_v6  ;;  %v1673_v36 = vmul.f32 1.442695, %v1650_v56 }
0x2a35   :  { %v1671_v41 = vmul.f32 1.442695, %v1645_v13 }
0x2a37   :  { %2127 = vpow2.f32 %v1671_v41 }
0x2a38   :  { %v2120_v17 = vpop.eup %2119  ;;  %2129 = vpow2.f32 %v1673_v36 }
0x2a39   :  { %v2122_v37 = vpop.eup %2121  ;;  %1681 = vadd.xlane.f32.xlu1 %v2120_v17 }
0x2a3a   :  { %1679 = vadd.xlane.f32.xlu0 %v2122_v37 }
0x2a3d   :  { %v2124_v38 = vpop.eup %2123 }
0x2a3e   :  { %1683 = vadd.xlane.f32.xlu0 %v2124_v38  ;;  %v2126_v39 = vpop.eup %2125 }
0x2a41   :  { %v2128_v40 = vpop.eup %2127 }
0x2a42   :  { %1685 = vadd.xlane.f32.xlu0 %v2126_v39  ;;  %1687 = vadd.xlane.f32.xlu1 %v2128_v40  ;;  %v2130_v21 = vpop.eup %2129 }
0x2a46   :  { %1689 = vadd.xlane.f32.xlu0 %v2130_v21 }
0x2a9a   :  { %v2027_v45 = vpop.f32.mrb[42].mxu0 }
0x2a9b   :  { %v1660_v46 = vadd.f32 %v2027_v45, %v1756_v18  ;;  %v1654_v47 = vpop.f32.mrb[43].mxu0 }
0x2a9c   :  { %v1655_v26 = vadd.f32 %v1756_v18, %v1654_v47 }
0x2a9d   :  { %v1677_v32 = vmul.f32 1.442695, %v1660_v46 }
0x2a9e   :  { %v1675_v34 = vmul.f32 1.442695, %v1655_v26 }
0x2a9f   :  { %2131 = vpow2.f32 %v1677_v32 }
0x2aa0   :  { %2133 = vpow2.f32 %v1675_v34 }
0x2aa9   :  { %v2132_v42 = vpop.eup %2131 }
0x2aaa   :  { %v2134_v48 = vpop.eup %2133  ;;  %1693 = vadd.xlane.f32.xlu0 %v2132_v42 }
0x2aab   :  { %1691 = vadd.xlane.f32.xlu1 %v2134_v48 }
0x2ac6   :  { %v1682_v50 = vpop.xlane.xlu1 %1681 }
0x2ac7   :  { %2135 = vrcp.f32 %v1682_v50  ;;  %v1680_v51 = vpop.xlane.xlu0 %1679 }
0x2ac8   :  { %2137 = vrcp.f32 %v1680_v51 }
0x2acb   :  { %v1684_v54 = vpop.xlane.xlu0 %1683 }
0x2acc   :  { %2139 = vrcp.f32 %v1684_v54 }
0x2acf   :  { %v1686_v52 = vpop.xlane.xlu0 %1685  ;;  %v1688_v59 = vpop.xlane.xlu1 %1687 }
0x2ad0   :  { %2141 = vrcp.f32 %v1686_v52 }
0x2ad1   :  { %v2136_v49 = vpop.eup %2135  ;;  %2143 = vrcp.f32 %v1688_v59 }
0x2ad2   :  { %v2138_v53 = vpop.eup %2137  ;;  %v1704_v55 = vmul.f32 %v2136_v49, %v2120_v17 }
0x2ad3   :  { %v1703_v57 = vmul.f32 %v2138_v53, %v2122_v37  ;;  %v1690_v23 = vpop.xlane.xlu0 %1689 }
0x2ad4   :  { %1712 = vst [vmem:[%s2667_s2 + $0x8] sm:$0xff] %v1704_v55  ;;  %2145 = vrcp.f32 %v1690_v23 }
0x2ad5   :  { %1711 = vst [vmem:[%s2667_s2] sm:$0xff] %v1703_v57 }
0x2ad6   :  { %v2140_v58 = vpop.eup %2139 }
0x2ad7   :  { %v1705_v60 = vmul.f32 %v2140_v58, %v2124_v38 }
0x2ad9   :  { %1713 = vst [vmem:[%s2667_s2 + $0x10] sm:$0xff] %v1705_v60 }
0x2ada   :  { %v2142_v61 = vpop.eup %2141 }
0x2adb   :  { %v2144_v15 = vpop.eup %2143  ;;  %v1706_v62 = vmul.f32 %v2142_v61, %v2126_v39 }
0x2adc   :  { %v1707_v8 = vmul.f32 %v2144_v15, %v2128_v40 }
0x2add   :  { %1714 = vst [vmem:[%s2667_s2 + $0x18] sm:$0xff] %v1706_v62 }
0x2ade   :  { %v2146_v22 = vpop.eup %2145  ;;  %1715 = vst [vmem:[%s2667_s2 + $0x20] sm:$0xff] %v1707_v8 }
0x2adf   :  { %v1708_v20 = vmul.f32 %v2146_v22, %v2130_v21 }
0x2ae1   :  { %1716 = vst [vmem:[%s2667_s2 + $0x28] sm:$0xff] %v1708_v20 }
0x2b37   :  { %v1694_v14 = vpop.xlane.xlu0 %1693 }
0x2b38   :  { %2147 = vrcp.f32 %v1694_v14  ;;  %v1692_v28 = vpop.xlane.xlu1 %1691 }
0x2b39   :  { %2149 = vrcp.f32 %v1692_v28 }
0x2b42   :  { %v2148_v63 = vpop.eup %2147 }
0x2b43   :  { %v2150_v0 = vpop.eup %2149  ;;  %v1710_v1 = vmul.f32 %v2148_v63, %v2132_v42 }
0x2b44   :  { %v1709_v3 = vmul.f32 %v2150_v0, %v2134_v48 }
0x2b45   :  { %1718 = vst [vmem:[%s2667_s2 + $0x38] sm:$0xff] %v1710_v1 }
0x2b46   :  { %1717 = vst [vmem:[%s2667_s2 + $0x30] sm:$0xff] %v1709_v3 }
0x2b47   :  { %1723 = vsyncpa [#allocation4], 1 }

</bundles_post_ra>
